<compile_context>
chip_gen: v7x
topology: tpu7x:2x2x1
jax: 0.10.0
libtpu: 0.0.40
codegen_flags: <defaults>
</compile_context>

<pallas_src>
import functools
import math

import jax
import jax.numpy as jnp
from jax.experimental import pallas as pl
from jax.experimental.pallas import tpu as pltpu


def _layer_norm_f32(x, w, b, eps=1e-5):
    # Matches the fp16-safe LayerNorm: statistics + affine in float32.
    x32 = x.astype(jnp.float32)
    mu = jnp.mean(x32, axis=-1, keepdims=True)
    var = jnp.mean((x32 - mu) ** 2, axis=-1, keepdims=True)
    return (x32 - mu) * jax.lax.rsqrt(var + eps) * w + b


def resblock_kernel(x_ref,
                    ln1_w_ref, ln1_b_ref,
                    wqkv_ref, bqkv_ref, wo_ref, bo_ref,
                    ln2_w_ref, ln2_b_ref,
                    wfc_ref, bfc_ref, wproj_ref, bproj_ref,
                    o_ref,
                    *, n_head):
    x = x_ref[...]                      # (S, D) — batch dim squeezed by BlockSpec
    S, D = x.shape
    Dh = D // n_head
    scale = 1.0 / math.sqrt(Dh)

    # ---------------- attention branch: x + MHA(LN1(x)) ----------------
    h = _layer_norm_f32(x, ln1_w_ref[...], ln1_b_ref[...])                  # (S, D) f32
    # bf16 operands, f32 accumulation (MXU-native).
    qkv = jnp.dot(h.astype(jnp.bfloat16), wqkv_ref[...],
                  preferred_element_type=jnp.float32) + bqkv_ref[...]       # (S, 3D) f32
    q = qkv[:, 0 * D:1 * D] * scale       # PyTorch scales q by Dh**-0.5
    k = qkv[:, 1 * D:2 * D]
    v = qkv[:, 2 * D:3 * D]

    # Per-head attention with the output projection folded into the loop:
    # acc += softmax(q_h k_h^T) v_h @ W_o[h]  — no concat, bounded live ranges.
    attn_acc = jnp.zeros((S, D), jnp.float32)
    for hd in range(n_head):
        sl = slice(hd * Dh, (hd + 1) * Dh)
        qh = q[:, sl].astype(jnp.bfloat16)                                  # (S, Dh)
        kh = k[:, sl].astype(jnp.bfloat16)
        vh = v[:, sl].astype(jnp.bfloat16)
        # Contract last dims directly (no explicit .T / XLU transpose).
        s = jnp.einsum('qd,kd->qk', qh, kh,
                       preferred_element_type=jnp.float32)                  # (S, S) f32
        s = s - jnp.max(s, axis=-1, keepdims=True)
        p = jnp.exp(s)
        p = p * pl.reciprocal(jnp.sum(p, axis=-1, keepdims=True), approx=True)
        oh = jnp.dot(p.astype(jnp.bfloat16), vh,
                     preferred_element_type=jnp.float32)                    # (S, Dh) f32
        attn_acc = attn_acc + jnp.dot(oh.astype(jnp.bfloat16), wo_ref[sl, :],
                                      preferred_element_type=jnp.float32)   # (S, D)
    attn = attn_acc + bo_ref[...]
    # TODO(synk): attention dropout omitted (eval-mode identity).
    x = x + attn.astype(x.dtype)

    # -------- MLP branch: x + c_proj(QuickGELU(c_fc(LN2(x)))) --------
    h2 = _layer_norm_f32(x, ln2_w_ref[...], ln2_b_ref[...])                 # (S, D) f32
    hfc = jnp.dot(h2.astype(jnp.bfloat16), wfc_ref[...],
                  preferred_element_type=jnp.float32) + bfc_ref[...]        # (S, 4D) f32
    hfc = hfc * jax.nn.sigmoid(1.702 * hfc)                                 # QuickGELU (f32)
    # TODO(synk): mlp dropout omitted (eval-mode identity).
    hproj = jnp.dot(hfc.astype(jnp.bfloat16), wproj_ref[...],
                    preferred_element_type=jnp.float32) + bproj_ref[...]    # (S, D) f32
    x = x + hproj.astype(x.dtype)

    o_ref[...] = x


def _vmem_limit_bytes(S, D):
    # bf16 weights (12*D^2 elems), double-buffered by the full-array BlockSpecs,
    # plus f32 x tiles and activation/score headroom.
    weight_bytes = 12 * D * D * 2 * 2
    act_bytes = 2 * (2 * S * D * 4)
    scratch = 8 * S * max(4 * D, S) * 4
    total = int((weight_bytes + act_bytes + scratch) * 1.5) + (4 << 20)
    # Keep within v7x's 64 MiB physical VMEM; never below the common 32 MiB default.
    return min(max(total, 32 * 1024 * 1024), 64 * 1024 * 1024)


def residual_attention_block(x, p, n_head):
    B, S, D = x.shape
    kern = functools.partial(resblock_kernel, n_head=n_head)

    # Weights feed the MXU: cast to bf16 (halves HBM traffic and VMEM residency).
    # Biases / LN params stay f32 (accumulation dtype).
    bf16 = jnp.bfloat16
    wqkv = p["wqkv"].astype(bf16)
    wo = p["wo"].astype(bf16)
    wfc = p["wfc"].astype(bf16)
    wproj = p["wproj"].astype(bf16)

    def full(shape):
        nd = len(shape)
        return pl.BlockSpec(shape, lambda b, _nd=nd: (0,) * _nd)
    # TODO(synk): for D >= 1024 on v7x, additionally single-buffer the weight
    # specs (pipeline_mode=pl.Buffered(1)) or tile the MLP K/N dims.

    in_specs = [
        pl.BlockSpec((None, S, D), lambda b: (b, 0, 0)),    # x, batch dim squeezed
        full(p["ln1_w"].shape), full(p["ln1_b"].shape),
        full(wqkv.shape), full(p["bqkv"].shape),
        full(wo.shape), full(p["bo"].shape),
        full(p["ln2_w"].shape), full(p["ln2_b"].shape),
        full(wfc.shape), full(p["bfc"].shape),
        full(wproj.shape), full(p["bproj"].shape),
    ]
    return pl.pallas_call(
        kern,
        out_shape=jax.ShapeDtypeStruct((B, S, D), x.dtype),
        grid=(B,),
        in_specs=in_specs,
        out_specs=pl.BlockSpec((None, S, D), lambda b: (b, 0, 0)),
        compiler_params=pltpu.CompilerParams(
            dimension_semantics=("parallel",),
            vmem_limit_bytes=_vmem_limit_bytes(S, D)),
    )(x,
      p["ln1_w"], p["ln1_b"],
      wqkv, p["bqkv"], wo, p["bo"],
      p["ln2_w"], p["ln2_b"],
      wfc, p["bfc"], wproj, p["bproj"])


def transformer_forward(x, layer_params, n_head):
    for p in layer_params:
        x = residual_attention_block(x, p, n_head)
    return x


def init_layer_params(key, d_model):
    # Weights are stored pre-transposed to (in, out) so the kernel does x @ W.
    keys = jax.random.split(key, 6)
    s = 0.02
    return {
        "ln1_w": jnp.ones((1, d_model), jnp.float32),
        "ln1_b": jnp.zeros((1, d_model), jnp.float32),
        "wqkv": s * jax.random.normal(keys[0], (d_model, 3 * d_model), jnp.float32),
        "bqkv": s * jax.random.normal(keys[1], (1, 3 * d_model), jnp.float32),
        "wo": s * jax.random.normal(keys[2], (d_model, d_model), jnp.float32),
        "bo": jnp.zeros((1, d_model), jnp.float32),
        "ln2_w": jnp.ones((1, d_model), jnp.float32),
        "ln2_b": jnp.zeros((1, d_model), jnp.float32),
        "wfc": s * jax.random.normal(keys[3], (d_model, 4 * d_model), jnp.float32),
        "bfc": s * jax.random.normal(keys[4], (1, 4 * d_model), jnp.float32),
        "wproj": s * jax.random.normal(keys[5], (4 * d_model, d_model), jnp.float32),
        "bproj": jnp.zeros((1, d_model), jnp.float32),
    }


if __name__ == "__main__":
    # Small config consistent with TransformerConfig(width, layers, heads)
    B, S = 2, 8
    width, layers, heads = 64, 2, 4      # head_dim = 16

    root = jax.random.PRNGKey(0)
    keys = jax.random.split(root, layers + 1)
    x = jax.random.normal(keys[0], (B, S, width), jnp.float32)
    layer_params = [init_layer_params(keys[i + 1], width) for i in range(layers)]

    fwd = jax.jit(functools.partial(transformer_forward, n_head=heads))
    out = fwd(x, layer_params)
    out = jax.block_until_ready(out)
    assert out.shape == (B, S, width) and out.dtype == jnp.float32
    assert bool(jnp.all(jnp.isfinite(out)))
    print("KERNEL_OK")
</pallas_src>

<mosaic_0001>
module attributes {stable_mosaic.version = 11 : i64} {
  func.func @resblock_kernel(%arg0: i32, %arg1: memref<1x8x64xf32, #tpu.memory_space<vmem>>, %arg2: memref<1x64xf32, #tpu.memory_space<vmem>>, %arg3: memref<1x64xf32, #tpu.memory_space<vmem>>, %arg4: memref<64x192xbf16, #tpu.memory_space<vmem>>, %arg5: memref<1x192xf32, #tpu.memory_space<vmem>>, %arg6: memref<64x64xbf16, #tpu.memory_space<vmem>>, %arg7: memref<1x64xf32, #tpu.memory_space<vmem>>, %arg8: memref<1x64xf32, #tpu.memory_space<vmem>>, %arg9: memref<1x64xf32, #tpu.memory_space<vmem>>, %arg10: memref<64x256xbf16, #tpu.memory_space<vmem>>, %arg11: memref<1x256xf32, #tpu.memory_space<vmem>>, %arg12: memref<256x64xbf16, #tpu.memory_space<vmem>>, %arg13: memref<1x64xf32, #tpu.memory_space<vmem>>, %arg14: memref<1x8x64xf32, #tpu.memory_space<vmem>>) attributes {dimension_semantics = [#tpu.dimension_semantics<parallel>], iteration_bounds = array<i64: 2>, scalar_prefetch = 0 : i64, scratch_operands = 0 : i64, tpu.core_type = #tpu.core_type<tc>, window_params = [{transform_indices = @transform_0, window_bounds = array<i64: 1, 8, 64>}, {pipeline_mode = #tpu.pipeline_mode<synchronous>, transform_indices = @transform_1, window_bounds = array<i64: 1, 64>}, {pipeline_mode = #tpu.pipeline_mode<synchronous>, transform_indices = @transform_2, window_bounds = array<i64: 1, 64>}, {pipeline_mode = #tpu.pipeline_mode<synchronous>, transform_indices = @transform_3, window_bounds = array<i64: 64, 192>}, {pipeline_mode = #tpu.pipeline_mode<synchronous>, transform_indices = @transform_4, window_bounds = array<i64: 1, 192>}, {pipeline_mode = #tpu.pipeline_mode<synchronous>, transform_indices = @transform_5, window_bounds = array<i64: 64, 64>}, {pipeline_mode = #tpu.pipeline_mode<synchronous>, transform_indices = @transform_6, window_bounds = array<i64: 1, 64>}, {pipeline_mode = #tpu.pipeline_mode<synchronous>, transform_indices = @transform_7, window_bounds = array<i64: 1, 64>}, {pipeline_mode = #tpu.pipeline_mode<synchronous>, transform_indices = @transform_8, window_bounds = array<i64: 1, 64>}, {pipeline_mode = #tpu.pipeline_mode<synchronous>, transform_indices = @transform_9, window_bounds = array<i64: 64, 256>}, {pipeline_mode = #tpu.pipeline_mode<synchronous>, transform_indices = @transform_10, window_bounds = array<i64: 1, 256>}, {pipeline_mode = #tpu.pipeline_mode<synchronous>, transform_indices = @transform_11, window_bounds = array<i64: 256, 64>}, {pipeline_mode = #tpu.pipeline_mode<synchronous>, transform_indices = @transform_12, window_bounds = array<i64: 1, 64>}, {transform_indices = @transform_13, window_bounds = array<i64: 1, 8, 64>}]} {
    %c0 = arith.constant 0 : index
    %c0_0 = arith.constant 0 : index
    %c0_1 = arith.constant 0 : index
    %0 = vector.load %arg1[%c0, %c0_0, %c0_1] : memref<1x8x64xf32, #tpu.memory_space<vmem>>, vector<1x8x64xf32>
    %1 = vector.shape_cast %0 : vector<1x8x64xf32> to vector<8x64xf32>
    %c0_2 = arith.constant 0 : index
    %c0_3 = arith.constant 0 : index
    %2 = vector.load %arg2[%c0_2, %c0_3] : memref<1x64xf32, #tpu.memory_space<vmem>>, vector<1x64xf32>
    %c0_4 = arith.constant 0 : index
    %c0_5 = arith.constant 0 : index
    %3 = vector.load %arg3[%c0_4, %c0_5] : memref<1x64xf32, #tpu.memory_space<vmem>>, vector<1x64xf32>
    %cst = arith.constant dense<0.000000e+00> : vector<8xf32>
    %4 = vector.multi_reduction <add>, %1, %cst [1] : vector<8x64xf32> to vector<8xf32>
    %5 = vector.shape_cast %4 : vector<8xf32> to vector<8x1xf32>
    %cst_6 = arith.constant 6.400000e+01 : f32
    %6 = vector.broadcast %cst_6 : f32 to vector<8x1xf32>
    %7 = arith.divf %5, %6 : vector<8x1xf32>
    %8 = vector.broadcast %7 : vector<8x1xf32> to vector<8x64xf32>
    %9 = arith.subf %1, %8 : vector<8x64xf32>
    %10 = arith.mulf %9, %9 : vector<8x64xf32>
    %cst_7 = arith.constant dense<0.000000e+00> : vector<8xf32>
    %11 = vector.multi_reduction <add>, %10, %cst_7 [1] : vector<8x64xf32> to vector<8xf32>
    %12 = vector.shape_cast %11 : vector<8xf32> to vector<8x1xf32>
    %cst_8 = arith.constant 6.400000e+01 : f32
    %13 = vector.broadcast %cst_8 : f32 to vector<8x1xf32>
    %14 = arith.divf %12, %13 : vector<8x1xf32>
    %15 = vector.broadcast %7 : vector<8x1xf32> to vector<8x64xf32>
    %16 = arith.subf %1, %15 : vector<8x64xf32>
    %cst_9 = arith.constant 9.99999974E-6 : f32
    %17 = vector.broadcast %cst_9 : f32 to vector<8x1xf32>
    %18 = arith.addf %14, %17 : vector<8x1xf32>
    %19 = math.rsqrt %18 : vector<8x1xf32>
    %20 = vector.broadcast %19 : vector<8x1xf32> to vector<8x64xf32>
    %21 = arith.mulf %16, %20 : vector<8x64xf32>
    %22 = vector.broadcast %2 : vector<1x64xf32> to vector<8x64xf32>
    %23 = arith.mulf %21, %22 : vector<8x64xf32>
    %24 = vector.broadcast %3 : vector<1x64xf32> to vector<8x64xf32>
    %25 = arith.addf %23, %24 : vector<8x64xf32>
    %26 = arith.truncf %25 : vector<8x64xf32> to vector<8x64xbf16>
    %c0_10 = arith.constant 0 : index
    %c0_11 = arith.constant 0 : index
    %27 = vector.load %arg4[%c0_10, %c0_11] : memref<64x192xbf16, #tpu.memory_space<vmem>>, vector<64x192xbf16>
    %cst_12 = arith.constant dense<0.000000e+00> : vector<8x192xf32>
    %28 = tpu.matmul %26, %27, %cst_12 {dimension_numbers = #tpu.dot_dimension_numbers<[1], [0], [0], [1], [0, 0, 1, 1], [], []>} : vector<8x64xbf16>, vector<64x192xbf16>, vector<8x192xf32> -> vector<8x192xf32>
    %c0_13 = arith.constant 0 : index
    %c0_14 = arith.constant 0 : index
    %29 = vector.load %arg5[%c0_13, %c0_14] : memref<1x192xf32, #tpu.memory_space<vmem>>, vector<1x192xf32>
    %30 = vector.broadcast %29 : vector<1x192xf32> to vector<8x192xf32>
    %31 = arith.addf %28, %30 : vector<8x192xf32>
    %32 = vector.extract_strided_slice %31 {offsets = [0, 0], sizes = [8, 64], strides = [1, 1]} : vector<8x192xf32> to vector<8x64xf32>
    %cst_15 = arith.constant 2.500000e-01 : f32
    %33 = vector.broadcast %cst_15 : f32 to vector<8x64xf32>
    %34 = arith.mulf %32, %33 : vector<8x64xf32>
    %35 = vector.extract_strided_slice %31 {offsets = [0, 64], sizes = [8, 64], strides = [1, 1]} : vector<8x192xf32> to vector<8x64xf32>
    %36 = vector.extract_strided_slice %31 {offsets = [0, 128], sizes = [8, 64], strides = [1, 1]} : vector<8x192xf32> to vector<8x64xf32>
    %cst_16 = arith.constant 0.000000e+00 : f32
    %37 = vector.broadcast %cst_16 : f32 to vector<8x64xf32>
    %38 = vector.extract_strided_slice %34 {offsets = [0, 0], sizes = [8, 16], strides = [1, 1]} : vector<8x64xf32> to vector<8x16xf32>
    %39 = arith.truncf %38 : vector<8x16xf32> to vector<8x16xbf16>
    %40 = vector.extract_strided_slice %35 {offsets = [0, 0], sizes = [8, 16], strides = [1, 1]} : vector<8x64xf32> to vector<8x16xf32>
    %41 = arith.truncf %40 : vector<8x16xf32> to vector<8x16xbf16>
    %42 = vector.extract_strided_slice %36 {offsets = [0, 0], sizes = [8, 16], strides = [1, 1]} : vector<8x64xf32> to vector<8x16xf32>
    %43 = arith.truncf %42 : vector<8x16xf32> to vector<8x16xbf16>
    "tpu.trace_start"() <{level = 10 : i32, message = "qd,kd->qk"}> : () -> ()
    %cst_17 = arith.constant dense<0.000000e+00> : vector<8x8xf32>
    %44 = tpu.matmul %39, %41, %cst_17 {dimension_numbers = #tpu.dot_dimension_numbers<[1], [1], [0], [0], [0, 0, 1, 0], [], []>} : vector<8x16xbf16>, vector<8x16xbf16>, vector<8x8xf32> -> vector<8x8xf32>
    "tpu.trace_stop"() : () -> ()
    %cst_18 = arith.constant dense<0xFF800000> : vector<8xf32>
    %45 = vector.multi_reduction <maximumf>, %44, %cst_18 [1] : vector<8x8xf32> to vector<8xf32>
    %46 = vector.shape_cast %45 : vector<8xf32> to vector<8x1xf32>
    %47 = vector.broadcast %46 : vector<8x1xf32> to vector<8x8xf32>
    %48 = arith.subf %44, %47 : vector<8x8xf32>
    %49 = math.exp %48 : vector<8x8xf32>
    %cst_19 = arith.constant dense<0.000000e+00> : vector<8xf32>
    %50 = vector.multi_reduction <add>, %49, %cst_19 [1] : vector<8x8xf32> to vector<8xf32>
    %51 = vector.shape_cast %50 : vector<8xf32> to vector<8x1xf32>
    %52 = tpu.reciprocal %51 {approx = true} : vector<8x1xf32> -> vector<8x1xf32>
    %53 = vector.broadcast %52 : vector<8x1xf32> to vector<8x8xf32>
    %54 = arith.mulf %49, %53 : vector<8x8xf32>
    %55 = arith.truncf %54 : vector<8x8xf32> to vector<8x8xbf16>
    %cst_20 = arith.constant dense<0.000000e+00> : vector<8x16xf32>
    %56 = tpu.matmul %55, %43, %cst_20 {dimension_numbers = #tpu.dot_dimension_numbers<[1], [0], [0], [1], [0, 0, 1, 1], [], []>} : vector<8x8xbf16>, vector<8x16xbf16>, vector<8x16xf32> -> vector<8x16xf32>
    %57 = arith.truncf %56 : vector<8x16xf32> to vector<8x16xbf16>
    %c0_21 = arith.constant 0 : index
    %c0_22 = arith.constant 0 : index
    %58 = vector.load %arg6[%c0_21, %c0_22] : memref<64x64xbf16, #tpu.memory_space<vmem>>, vector<16x64xbf16>
    %cst_23 = arith.constant dense<0.000000e+00> : vector<8x64xf32>
    %59 = tpu.matmul %57, %58, %cst_23 {dimension_numbers = #tpu.dot_dimension_numbers<[1], [0], [0], [1], [0, 0, 1, 1], [], []>} : vector<8x16xbf16>, vector<16x64xbf16>, vector<8x64xf32> -> vector<8x64xf32>
    %60 = arith.addf %37, %59 : vector<8x64xf32>
    %61 = vector.extract_strided_slice %34 {offsets = [0, 16], sizes = [8, 16], strides = [1, 1]} : vector<8x64xf32> to vector<8x16xf32>
    %62 = arith.truncf %61 : vector<8x16xf32> to vector<8x16xbf16>
    %63 = vector.extract_strided_slice %35 {offsets = [0, 16], sizes = [8, 16], strides = [1, 1]} : vector<8x64xf32> to vector<8x16xf32>
    %64 = arith.truncf %63 : vector<8x16xf32> to vector<8x16xbf16>
    %65 = vector.extract_strided_slice %36 {offsets = [0, 16], sizes = [8, 16], strides = [1, 1]} : vector<8x64xf32> to vector<8x16xf32>
    %66 = arith.truncf %65 : vector<8x16xf32> to vector<8x16xbf16>
    "tpu.trace_start"() <{level = 10 : i32, message = "qd,kd->qk"}> : () -> ()
    %cst_24 = arith.constant dense<0.000000e+00> : vector<8x8xf32>
    %67 = tpu.matmul %62, %64, %cst_24 {dimension_numbers = #tpu.dot_dimension_numbers<[1], [1], [0], [0], [0, 0, 1, 0], [], []>} : vector<8x16xbf16>, vector<8x16xbf16>, vector<8x8xf32> -> vector<8x8xf32>
    "tpu.trace_stop"() : () -> ()
    %cst_25 = arith.constant dense<0xFF800000> : vector<8xf32>
    %68 = vector.multi_reduction <maximumf>, %67, %cst_25 [1] : vector<8x8xf32> to vector<8xf32>
    %69 = vector.shape_cast %68 : vector<8xf32> to vector<8x1xf32>
    %70 = vector.broadcast %69 : vector<8x1xf32> to vector<8x8xf32>
    %71 = arith.subf %67, %70 : vector<8x8xf32>
    %72 = math.exp %71 : vector<8x8xf32>
    %cst_26 = arith.constant dense<0.000000e+00> : vector<8xf32>
    %73 = vector.multi_reduction <add>, %72, %cst_26 [1] : vector<8x8xf32> to vector<8xf32>
    %74 = vector.shape_cast %73 : vector<8xf32> to vector<8x1xf32>
    %75 = tpu.reciprocal %74 {approx = true} : vector<8x1xf32> -> vector<8x1xf32>
    %76 = vector.broadcast %75 : vector<8x1xf32> to vector<8x8xf32>
    %77 = arith.mulf %72, %76 : vector<8x8xf32>
    %78 = arith.truncf %77 : vector<8x8xf32> to vector<8x8xbf16>
    %cst_27 = arith.constant dense<0.000000e+00> : vector<8x16xf32>
    %79 = tpu.matmul %78, %66, %cst_27 {dimension_numbers = #tpu.dot_dimension_numbers<[1], [0], [0], [1], [0, 0, 1, 1], [], []>} : vector<8x8xbf16>, vector<8x16xbf16>, vector<8x16xf32> -> vector<8x16xf32>
    %80 = arith.truncf %79 : vector<8x16xf32> to vector<8x16xbf16>
    %c16 = arith.constant 16 : index
    %c0_28 = arith.constant 0 : index
    %81 = vector.load %arg6[%c16, %c0_28] : memref<64x64xbf16, #tpu.memory_space<vmem>>, vector<16x64xbf16>
    %cst_29 = arith.constant dense<0.000000e+00> : vector<8x64xf32>
    %82 = tpu.matmul %80, %81, %cst_29 {dimension_numbers = #tpu.dot_dimension_numbers<[1], [0], [0], [1], [0, 0, 1, 1], [], []>} : vector<8x16xbf16>, vector<16x64xbf16>, vector<8x64xf32> -> vector<8x64xf32>
    %83 = arith.addf %60, %82 : vector<8x64xf32>
    %84 = vector.extract_strided_slice %34 {offsets = [0, 32], sizes = [8, 16], strides = [1, 1]} : vector<8x64xf32> to vector<8x16xf32>
    %85 = arith.truncf %84 : vector<8x16xf32> to vector<8x16xbf16>
    %86 = vector.extract_strided_slice %35 {offsets = [0, 32], sizes = [8, 16], strides = [1, 1]} : vector<8x64xf32> to vector<8x16xf32>
    %87 = arith.truncf %86 : vector<8x16xf32> to vector<8x16xbf16>
    %88 = vector.extract_strided_slice %36 {offsets = [0, 32], sizes = [8, 16], strides = [1, 1]} : vector<8x64xf32> to vector<8x16xf32>
    %89 = arith.truncf %88 : vector<8x16xf32> to vector<8x16xbf16>
    "tpu.trace_start"() <{level = 10 : i32, message = "qd,kd->qk"}> : () -> ()
    %cst_30 = arith.constant dense<0.000000e+00> : vector<8x8xf32>
    %90 = tpu.matmul %85, %87, %cst_30 {dimension_numbers = #tpu.dot_dimension_numbers<[1], [1], [0], [0], [0, 0, 1, 0], [], []>} : vector<8x16xbf16>, vector<8x16xbf16>, vector<8x8xf32> -> vector<8x8xf32>
    "tpu.trace_stop"() : () -> ()
    %cst_31 = arith.constant dense<0xFF800000> : vector<8xf32>
    %91 = vector.multi_reduction <maximumf>, %90, %cst_31 [1] : vector<8x8xf32> to vector<8xf32>
    %92 = vector.shape_cast %91 : vector<8xf32> to vector<8x1xf32>
    %93 = vector.broadcast %92 : vector<8x1xf32> to vector<8x8xf32>
    %94 = arith.subf %90, %93 : vector<8x8xf32>
    %95 = math.exp %94 : vector<8x8xf32>
    %cst_32 = arith.constant dense<0.000000e+00> : vector<8xf32>
    %96 = vector.multi_reduction <add>, %95, %cst_32 [1] : vector<8x8xf32> to vector<8xf32>
    %97 = vector.shape_cast %96 : vector<8xf32> to vector<8x1xf32>
    %98 = tpu.reciprocal %97 {approx = true} : vector<8x1xf32> -> vector<8x1xf32>
    %99 = vector.broadcast %98 : vector<8x1xf32> to vector<8x8xf32>
    %100 = arith.mulf %95, %99 : vector<8x8xf32>
    %101 = arith.truncf %100 : vector<8x8xf32> to vector<8x8xbf16>
    %cst_33 = arith.constant dense<0.000000e+00> : vector<8x16xf32>
    %102 = tpu.matmul %101, %89, %cst_33 {dimension_numbers = #tpu.dot_dimension_numbers<[1], [0], [0], [1], [0, 0, 1, 1], [], []>} : vector<8x8xbf16>, vector<8x16xbf16>, vector<8x16xf32> -> vector<8x16xf32>
    %103 = arith.truncf %102 : vector<8x16xf32> to vector<8x16xbf16>
    %c32 = arith.constant 32 : index
    %c0_34 = arith.constant 0 : index
    %104 = vector.load %arg6[%c32, %c0_34] : memref<64x64xbf16, #tpu.memory_space<vmem>>, vector<16x64xbf16>
    %cst_35 = arith.constant dense<0.000000e+00> : vector<8x64xf32>
    %105 = tpu.matmul %103, %104, %cst_35 {dimension_numbers = #tpu.dot_dimension_numbers<[1], [0], [0], [1], [0, 0, 1, 1], [], []>} : vector<8x16xbf16>, vector<16x64xbf16>, vector<8x64xf32> -> vector<8x64xf32>
    %106 = arith.addf %83, %105 : vector<8x64xf32>
    %107 = vector.extract_strided_slice %34 {offsets = [0, 48], sizes = [8, 16], strides = [1, 1]} : vector<8x64xf32> to vector<8x16xf32>
    %108 = arith.truncf %107 : vector<8x16xf32> to vector<8x16xbf16>
    %109 = vector.extract_strided_slice %35 {offsets = [0, 48], sizes = [8, 16], strides = [1, 1]} : vector<8x64xf32> to vector<8x16xf32>
    %110 = arith.truncf %109 : vector<8x16xf32> to vector<8x16xbf16>
    %111 = vector.extract_strided_slice %36 {offsets = [0, 48], sizes = [8, 16], strides = [1, 1]} : vector<8x64xf32> to vector<8x16xf32>
    %112 = arith.truncf %111 : vector<8x16xf32> to vector<8x16xbf16>
    "tpu.trace_start"() <{level = 10 : i32, message = "qd,kd->qk"}> : () -> ()
    %cst_36 = arith.constant dense<0.000000e+00> : vector<8x8xf32>
    %113 = tpu.matmul %108, %110, %cst_36 {dimension_numbers = #tpu.dot_dimension_numbers<[1], [1], [0], [0], [0, 0, 1, 0], [], []>} : vector<8x16xbf16>, vector<8x16xbf16>, vector<8x8xf32> -> vector<8x8xf32>
    "tpu.trace_stop"() : () -> ()
    %cst_37 = arith.constant dense<0xFF800000> : vector<8xf32>
    %114 = vector.multi_reduction <maximumf>, %113, %cst_37 [1] : vector<8x8xf32> to vector<8xf32>
    %115 = vector.shape_cast %114 : vector<8xf32> to vector<8x1xf32>
    %116 = vector.broadcast %115 : vector<8x1xf32> to vector<8x8xf32>
    %117 = arith.subf %113, %116 : vector<8x8xf32>
    %118 = math.exp %117 : vector<8x8xf32>
    %cst_38 = arith.constant dense<0.000000e+00> : vector<8xf32>
    %119 = vector.multi_reduction <add>, %118, %cst_38 [1] : vector<8x8xf32> to vector<8xf32>
    %120 = vector.shape_cast %119 : vector<8xf32> to vector<8x1xf32>
    %121 = tpu.reciprocal %120 {approx = true} : vector<8x1xf32> -> vector<8x1xf32>
    %122 = vector.broadcast %121 : vector<8x1xf32> to vector<8x8xf32>
    %123 = arith.mulf %118, %122 : vector<8x8xf32>
    %124 = arith.truncf %123 : vector<8x8xf32> to vector<8x8xbf16>
    %cst_39 = arith.constant dense<0.000000e+00> : vector<8x16xf32>
    %125 = tpu.matmul %124, %112, %cst_39 {dimension_numbers = #tpu.dot_dimension_numbers<[1], [0], [0], [1], [0, 0, 1, 1], [], []>} : vector<8x8xbf16>, vector<8x16xbf16>, vector<8x16xf32> -> vector<8x16xf32>
    %126 = arith.truncf %125 : vector<8x16xf32> to vector<8x16xbf16>
    %c48 = arith.constant 48 : index
    %c0_40 = arith.constant 0 : index
    %127 = vector.load %arg6[%c48, %c0_40] : memref<64x64xbf16, #tpu.memory_space<vmem>>, vector<16x64xbf16>
    %cst_41 = arith.constant dense<0.000000e+00> : vector<8x64xf32>
    %128 = tpu.matmul %126, %127, %cst_41 {dimension_numbers = #tpu.dot_dimension_numbers<[1], [0], [0], [1], [0, 0, 1, 1], [], []>} : vector<8x16xbf16>, vector<16x64xbf16>, vector<8x64xf32> -> vector<8x64xf32>
    %129 = arith.addf %106, %128 : vector<8x64xf32>
    %c0_42 = arith.constant 0 : index
    %c0_43 = arith.constant 0 : index
    %130 = vector.load %arg7[%c0_42, %c0_43] : memref<1x64xf32, #tpu.memory_space<vmem>>, vector<1x64xf32>
    %131 = vector.broadcast %130 : vector<1x64xf32> to vector<8x64xf32>
    %132 = arith.addf %129, %131 : vector<8x64xf32>
    %133 = arith.addf %1, %132 : vector<8x64xf32>
    %c0_44 = arith.constant 0 : index
    %c0_45 = arith.constant 0 : index
    %134 = vector.load %arg8[%c0_44, %c0_45] : memref<1x64xf32, #tpu.memory_space<vmem>>, vector<1x64xf32>
    %c0_46 = arith.constant 0 : index
    %c0_47 = arith.constant 0 : index
    %135 = vector.load %arg9[%c0_46, %c0_47] : memref<1x64xf32, #tpu.memory_space<vmem>>, vector<1x64xf32>
    %cst_48 = arith.constant dense<0.000000e+00> : vector<8xf32>
    %136 = vector.multi_reduction <add>, %133, %cst_48 [1] : vector<8x64xf32> to vector<8xf32>
    %137 = vector.shape_cast %136 : vector<8xf32> to vector<8x1xf32>
    %cst_49 = arith.constant 6.400000e+01 : f32
    %138 = vector.broadcast %cst_49 : f32 to vector<8x1xf32>
    %139 = arith.divf %137, %138 : vector<8x1xf32>
    %140 = vector.broadcast %139 : vector<8x1xf32> to vector<8x64xf32>
    %141 = arith.subf %133, %140 : vector<8x64xf32>
    %142 = arith.mulf %141, %141 : vector<8x64xf32>
    %cst_50 = arith.constant dense<0.000000e+00> : vector<8xf32>
    %143 = vector.multi_reduction <add>, %142, %cst_50 [1] : vector<8x64xf32> to vector<8xf32>
    %144 = vector.shape_cast %143 : vector<8xf32> to vector<8x1xf32>
    %cst_51 = arith.constant 6.400000e+01 : f32
    %145 = vector.broadcast %cst_51 : f32 to vector<8x1xf32>
    %146 = arith.divf %144, %145 : vector<8x1xf32>
    %147 = vector.broadcast %139 : vector<8x1xf32> to vector<8x64xf32>
    %148 = arith.subf %133, %147 : vector<8x64xf32>
    %cst_52 = arith.constant 9.99999974E-6 : f32
    %149 = vector.broadcast %cst_52 : f32 to vector<8x1xf32>
    %150 = arith.addf %146, %149 : vector<8x1xf32>
    %151 = math.rsqrt %150 : vector<8x1xf32>
    %152 = vector.broadcast %151 : vector<8x1xf32> to vector<8x64xf32>
    %153 = arith.mulf %148, %152 : vector<8x64xf32>
    %154 = vector.broadcast %134 : vector<1x64xf32> to vector<8x64xf32>
    %155 = arith.mulf %153, %154 : vector<8x64xf32>
    %156 = vector.broadcast %135 : vector<1x64xf32> to vector<8x64xf32>
    %157 = arith.addf %155, %156 : vector<8x64xf32>
    %158 = arith.truncf %157 : vector<8x64xf32> to vector<8x64xbf16>
    %c0_53 = arith.constant 0 : index
    %c0_54 = arith.constant 0 : index
    %159 = vector.load %arg10[%c0_53, %c0_54] : memref<64x256xbf16, #tpu.memory_space<vmem>>, vector<64x256xbf16>
    %cst_55 = arith.constant dense<0.000000e+00> : vector<8x256xf32>
    %160 = tpu.matmul %158, %159, %cst_55 {dimension_numbers = #tpu.dot_dimension_numbers<[1], [0], [0], [1], [0, 0, 1, 1], [], []>} : vector<8x64xbf16>, vector<64x256xbf16>, vector<8x256xf32> -> vector<8x256xf32>
    %c0_56 = arith.constant 0 : index
    %c0_57 = arith.constant 0 : index
    %161 = vector.load %arg11[%c0_56, %c0_57] : memref<1x256xf32, #tpu.memory_space<vmem>>, vector<1x256xf32>
    %162 = vector.broadcast %161 : vector<1x256xf32> to vector<8x256xf32>
    %163 = arith.addf %160, %162 : vector<8x256xf32>
    %cst_58 = arith.constant 1.702000e+00 : f32
    %164 = vector.broadcast %cst_58 : f32 to vector<8x256xf32>
    %165 = arith.mulf %164, %163 : vector<8x256xf32>
    %166 = arith.negf %165 : vector<8x256xf32>
    %167 = math.exp %166 : vector<8x256xf32>
    %cst_59 = arith.constant 1.000000e+00 : f32
    %168 = vector.broadcast %cst_59 : f32 to vector<8x256xf32>
    %169 = arith.addf %168, %167 : vector<8x256xf32>
    %170 = arith.divf %168, %169 : vector<8x256xf32>
    %171 = arith.mulf %163, %170 : vector<8x256xf32>
    %172 = arith.truncf %171 : vector<8x256xf32> to vector<8x256xbf16>
    %c0_60 = arith.constant 0 : index
    %c0_61 = arith.constant 0 : index
    %173 = vector.load %arg12[%c0_60, %c0_61] : memref<256x64xbf16, #tpu.memory_space<vmem>>, vector<256x64xbf16>
    %cst_62 = arith.constant dense<0.000000e+00> : vector<8x64xf32>
    %174 = tpu.matmul %172, %173, %cst_62 {dimension_numbers = #tpu.dot_dimension_numbers<[1], [0], [0], [1], [0, 0, 1, 1], [], []>} : vector<8x256xbf16>, vector<256x64xbf16>, vector<8x64xf32> -> vector<8x64xf32>
    %c0_63 = arith.constant 0 : index
    %c0_64 = arith.constant 0 : index
    %175 = vector.load %arg13[%c0_63, %c0_64] : memref<1x64xf32, #tpu.memory_space<vmem>>, vector<1x64xf32>
    %176 = vector.broadcast %175 : vector<1x64xf32> to vector<8x64xf32>
    %177 = arith.addf %174, %176 : vector<8x64xf32>
    %178 = arith.addf %133, %177 : vector<8x64xf32>
    %c0_65 = arith.constant 0 : index
    %c0_66 = arith.constant 0 : index
    %c0_67 = arith.constant 0 : index
    %179 = vector.load %arg14[%c0_65, %c0_66, %c0_67] : memref<1x8x64xf32, #tpu.memory_space<vmem>>, vector<1x8x64xf32>
    %180 = vector.shape_cast %179 : vector<1x8x64xf32> to vector<8x64xf32>
    %181 = vector.shape_cast %178 : vector<8x64xf32> to vector<1x8x64xf32>
    tpu.vector_store %arg14[%c0_65, %c0_66, %c0_67], %181 {strides = array<i32>} : memref<1x8x64xf32, #tpu.memory_space<vmem>>, vector<1x8x64xf32>,
    return
  }
  func.func @transform_0(%arg0: i32) -> (i32, i32, i32) {
    %c0_i32 = arith.constant 0 : i32
    %c0_i32_0 = arith.constant 0 : i32
    %c0_i32_1 = arith.constant 0 : i32
    return %arg0, %c0_i32, %c0_i32_0 : i32, i32, i32
  }
  func.func @transform_1(%arg0: i32) -> (i32, i32) {
    %c0_i32 = arith.constant 0 : i32
    %c0_i32_0 = arith.constant 0 : i32
    %c0_i32_1 = arith.constant 0 : i32
    return %c0_i32, %c0_i32_0 : i32, i32
  }
  func.func @transform_2(%arg0: i32) -> (i32, i32) {
    %c0_i32 = arith.constant 0 : i32
    %c0_i32_0 = arith.constant 0 : i32
    %c0_i32_1 = arith.constant 0 : i32
    return %c0_i32, %c0_i32_0 : i32, i32
  }
  func.func @transform_3(%arg0: i32) -> (i32, i32) {
    %c0_i32 = arith.constant 0 : i32
    %c0_i32_0 = arith.constant 0 : i32
    %c0_i32_1 = arith.constant 0 : i32
    return %c0_i32, %c0_i32_0 : i32, i32
  }
  func.func @transform_4(%arg0: i32) -> (i32, i32) {
    %c0_i32 = arith.constant 0 : i32
    %c0_i32_0 = arith.constant 0 : i32
    %c0_i32_1 = arith.constant 0 : i32
    return %c0_i32, %c0_i32_0 : i32, i32
  }
  func.func @transform_5(%arg0: i32) -> (i32, i32) {
    %c0_i32 = arith.constant 0 : i32
    %c0_i32_0 = arith.constant 0 : i32
    %c0_i32_1 = arith.constant 0 : i32
    return %c0_i32, %c0_i32_0 : i32, i32
  }
  func.func @transform_6(%arg0: i32) -> (i32, i32) {
    %c0_i32 = arith.constant 0 : i32
    %c0_i32_0 = arith.constant 0 : i32
    %c0_i32_1 = arith.constant 0 : i32
    return %c0_i32, %c0_i32_0 : i32, i32
  }
  func.func @transform_7(%arg0: i32) -> (i32, i32) {
    %c0_i32 = arith.constant 0 : i32
    %c0_i32_0 = arith.constant 0 : i32
    %c0_i32_1 = arith.constant 0 : i32
    return %c0_i32, %c0_i32_0 : i32, i32
  }
  func.func @transform_8(%arg0: i32) -> (i32, i32) {
    %c0_i32 = arith.constant 0 : i32
    %c0_i32_0 = arith.constant 0 : i32
    %c0_i32_1 = arith.constant 0 : i32
    return %c0_i32, %c0_i32_0 : i32, i32
  }
  func.func @transform_9(%arg0: i32) -> (i32, i32) {
    %c0_i32 = arith.constant 0 : i32
    %c0_i32_0 = arith.constant 0 : i32
    %c0_i32_1 = arith.constant 0 : i32
    return %c0_i32, %c0_i32_0 : i32, i32
  }
  func.func @transform_10(%arg0: i32) -> (i32, i32) {
    %c0_i32 = arith.constant 0 : i32
    %c0_i32_0 = arith.constant 0 : i32
    %c0_i32_1 = arith.constant 0 : i32
    return %c0_i32, %c0_i32_0 : i32, i32
  }
  func.func @transform_11(%arg0: i32) -> (i32, i32) {
    %c0_i32 = arith.constant 0 : i32
    %c0_i32_0 = arith.constant 0 : i32
    %c0_i32_1 = arith.constant 0 : i32
    return %c0_i32, %c0_i32_0 : i32, i32
  }
  func.func @transform_12(%arg0: i32) -> (i32, i32) {
    %c0_i32 = arith.constant 0 : i32
    %c0_i32_0 = arith.constant 0 : i32
    %c0_i32_1 = arith.constant 0 : i32
    return %c0_i32, %c0_i32_0 : i32, i32
  }
  func.func @transform_13(%arg0: i32) -> (i32, i32, i32) {
    %c0_i32 = arith.constant 0 : i32
    %c0_i32_0 = arith.constant 0 : i32
    %c0_i32_1 = arith.constant 0 : i32
    return %arg0, %c0_i32, %c0_i32_0 : i32, i32, i32
  }
}

module attributes {stable_mosaic.version = 11 : i64} {
  func.func @resblock_kernel(%arg0: i32, %arg1: memref<1x8x64xf32, #tpu.memory_space<vmem>>, %arg2: memref<1x64xf32, #tpu.memory_space<vmem>>, %arg3: memref<1x64xf32, #tpu.memory_space<vmem>>, %arg4: memref<64x192xbf16, #tpu.memory_space<vmem>>, %arg5: memref<1x192xf32, #tpu.memory_space<vmem>>, %arg6: memref<64x64xbf16, #tpu.memory_space<vmem>>, %arg7: memref<1x64xf32, #tpu.memory_space<vmem>>, %arg8: memref<1x64xf32, #tpu.memory_space<vmem>>, %arg9: memref<1x64xf32, #tpu.memory_space<vmem>>, %arg10: memref<64x256xbf16, #tpu.memory_space<vmem>>, %arg11: memref<1x256xf32, #tpu.memory_space<vmem>>, %arg12: memref<256x64xbf16, #tpu.memory_space<vmem>>, %arg13: memref<1x64xf32, #tpu.memory_space<vmem>>, %arg14: memref<1x8x64xf32, #tpu.memory_space<vmem>>) attributes {dimension_semantics = [#tpu.dimension_semantics<parallel>], iteration_bounds = array<i64: 2>, scalar_prefetch = 0 : i64, scratch_operands = 0 : i64, tpu.core_type = #tpu.core_type<tc>, window_params = [{transform_indices = @transform_0, window_bounds = array<i64: 1, 8, 64>}, {pipeline_mode = #tpu.pipeline_mode<synchronous>, transform_indices = @transform_1, window_bounds = array<i64: 1, 64>}, {pipeline_mode = #tpu.pipeline_mode<synchronous>, transform_indices = @transform_2, window_bounds = array<i64: 1, 64>}, {pipeline_mode = #tpu.pipeline_mode<synchronous>, transform_indices = @transform_3, window_bounds = array<i64: 64, 192>}, {pipeline_mode = #tpu.pipeline_mode<synchronous>, transform_indices = @transform_4, window_bounds = array<i64: 1, 192>}, {pipeline_mode = #tpu.pipeline_mode<synchronous>, transform_indices = @transform_5, window_bounds = array<i64: 64, 64>}, {pipeline_mode = #tpu.pipeline_mode<synchronous>, transform_indices = @transform_6, window_bounds = array<i64: 1, 64>}, {pipeline_mode = #tpu.pipeline_mode<synchronous>, transform_indices = @transform_7, window_bounds = array<i64: 1, 64>}, {pipeline_mode = #tpu.pipeline_mode<synchronous>, transform_indices = @transform_8, window_bounds = array<i64: 1, 64>}, {pipeline_mode = #tpu.pipeline_mode<synchronous>, transform_indices = @transform_9, window_bounds = array<i64: 64, 256>}, {pipeline_mode = #tpu.pipeline_mode<synchronous>, transform_indices = @transform_10, window_bounds = array<i64: 1, 256>}, {pipeline_mode = #tpu.pipeline_mode<synchronous>, transform_indices = @transform_11, window_bounds = array<i64: 256, 64>}, {pipeline_mode = #tpu.pipeline_mode<synchronous>, transform_indices = @transform_12, window_bounds = array<i64: 1, 64>}, {transform_indices = @transform_13, window_bounds = array<i64: 1, 8, 64>}]} {
    %c0 = arith.constant 0 : index
    %c0_0 = arith.constant 0 : index
    %c0_1 = arith.constant 0 : index
    %0 = vector.load %arg1[%c0, %c0_0, %c0_1] : memref<1x8x64xf32, #tpu.memory_space<vmem>>, vector<1x8x64xf32>
    %1 = vector.shape_cast %0 : vector<1x8x64xf32> to vector<8x64xf32>
    %c0_2 = arith.constant 0 : index
    %c0_3 = arith.constant 0 : index
    %2 = vector.load %arg2[%c0_2, %c0_3] : memref<1x64xf32, #tpu.memory_space<vmem>>, vector<1x64xf32>
    %c0_4 = arith.constant 0 : index
    %c0_5 = arith.constant 0 : index
    %3 = vector.load %arg3[%c0_4, %c0_5] : memref<1x64xf32, #tpu.memory_space<vmem>>, vector<1x64xf32>
    %cst = arith.constant dense<0.000000e+00> : vector<8xf32>
    %4 = vector.multi_reduction <add>, %1, %cst [1] : vector<8x64xf32> to vector<8xf32>
    %5 = vector.shape_cast %4 : vector<8xf32> to vector<8x1xf32>
    %cst_6 = arith.constant 6.400000e+01 : f32
    %6 = vector.broadcast %cst_6 : f32 to vector<8x1xf32>
    %7 = arith.divf %5, %6 : vector<8x1xf32>
    %8 = vector.broadcast %7 : vector<8x1xf32> to vector<8x64xf32>
    %9 = arith.subf %1, %8 : vector<8x64xf32>
    %10 = arith.mulf %9, %9 : vector<8x64xf32>
    %cst_7 = arith.constant dense<0.000000e+00> : vector<8xf32>
    %11 = vector.multi_reduction <add>, %10, %cst_7 [1] : vector<8x64xf32> to vector<8xf32>
    %12 = vector.shape_cast %11 : vector<8xf32> to vector<8x1xf32>
    %cst_8 = arith.constant 6.400000e+01 : f32
    %13 = vector.broadcast %cst_8 : f32 to vector<8x1xf32>
    %14 = arith.divf %12, %13 : vector<8x1xf32>
    %15 = vector.broadcast %7 : vector<8x1xf32> to vector<8x64xf32>
    %16 = arith.subf %1, %15 : vector<8x64xf32>
    %cst_9 = arith.constant 9.99999974E-6 : f32
    %17 = vector.broadcast %cst_9 : f32 to vector<8x1xf32>
    %18 = arith.addf %14, %17 : vector<8x1xf32>
    %19 = math.rsqrt %18 : vector<8x1xf32>
    %20 = vector.broadcast %19 : vector<8x1xf32> to vector<8x64xf32>
    %21 = arith.mulf %16, %20 : vector<8x64xf32>
    %22 = vector.broadcast %2 : vector<1x64xf32> to vector<8x64xf32>
    %23 = arith.mulf %21, %22 : vector<8x64xf32>
    %24 = vector.broadcast %3 : vector<1x64xf32> to vector<8x64xf32>
    %25 = arith.addf %23, %24 : vector<8x64xf32>
    %26 = arith.truncf %25 : vector<8x64xf32> to vector<8x64xbf16>
    %c0_10 = arith.constant 0 : index
    %c0_11 = arith.constant 0 : index
    %27 = vector.load %arg4[%c0_10, %c0_11] : memref<64x192xbf16, #tpu.memory_space<vmem>>, vector<64x192xbf16>
    %cst_12 = arith.constant dense<0.000000e+00> : vector<8x192xf32>
    %28 = tpu.matmul %26, %27, %cst_12 {dimension_numbers = #tpu.dot_dimension_numbers<[1], [0], [0], [1], [0, 0, 1, 1], [], []>} : vector<8x64xbf16>, vector<64x192xbf16>, vector<8x192xf32> -> vector<8x192xf32>
    %c0_13 = arith.constant 0 : index
    %c0_14 = arith.constant 0 : index
    %29 = vector.load %arg5[%c0_13, %c0_14] : memref<1x192xf32, #tpu.memory_space<vmem>>, vector<1x192xf32>
    %30 = vector.broadcast %29 : vector<1x192xf32> to vector<8x192xf32>
    %31 = arith.addf %28, %30 : vector<8x192xf32>
    %32 = vector.extract_strided_slice %31 {offsets = [0, 0], sizes = [8, 64], strides = [1, 1]} : vector<8x192xf32> to vector<8x64xf32>
    %cst_15 = arith.constant 2.500000e-01 : f32
    %33 = vector.broadcast %cst_15 : f32 to vector<8x64xf32>
    %34 = arith.mulf %32, %33 : vector<8x64xf32>
    %35 = vector.extract_strided_slice %31 {offsets = [0, 64], sizes = [8, 64], strides = [1, 1]} : vector<8x192xf32> to vector<8x64xf32>
    %36 = vector.extract_strided_slice %31 {offsets = [0, 128], sizes = [8, 64], strides = [1, 1]} : vector<8x192xf32> to vector<8x64xf32>
    %cst_16 = arith.constant 0.000000e+00 : f32
    %37 = vector.broadcast %cst_16 : f32 to vector<8x64xf32>
    %38 = vector.extract_strided_slice %34 {offsets = [0, 0], sizes = [8, 16], strides = [1, 1]} : vector<8x64xf32> to vector<8x16xf32>
    %39 = arith.truncf %38 : vector<8x16xf32> to vector<8x16xbf16>
    %40 = vector.extract_strided_slice %35 {offsets = [0, 0], sizes = [8, 16], strides = [1, 1]} : vector<8x64xf32> to vector<8x16xf32>
    %41 = arith.truncf %40 : vector<8x16xf32> to vector<8x16xbf16>
    %42 = vector.extract_strided_slice %36 {offsets = [0, 0], sizes = [8, 16], strides = [1, 1]} : vector<8x64xf32> to vector<8x16xf32>
    %43 = arith.truncf %42 : vector<8x16xf32> to vector<8x16xbf16>
    "tpu.trace_start"() <{level = 10 : i32, message = "qd,kd->qk"}> : () -> ()
    %cst_17 = arith.constant dense<0.000000e+00> : vector<8x8xf32>
    %44 = tpu.matmul %39, %41, %cst_17 {dimension_numbers = #tpu.dot_dimension_numbers<[1], [1], [0], [0], [0, 0, 1, 0], [], []>} : vector<8x16xbf16>, vector<8x16xbf16>, vector<8x8xf32> -> vector<8x8xf32>
    "tpu.trace_stop"() : () -> ()
    %cst_18 = arith.constant dense<0xFF800000> : vector<8xf32>
    %45 = vector.multi_reduction <maximumf>, %44, %cst_18 [1] : vector<8x8xf32> to vector<8xf32>
    %46 = vector.shape_cast %45 : vector<8xf32> to vector<8x1xf32>
    %47 = vector.broadcast %46 : vector<8x1xf32> to vector<8x8xf32>
    %48 = arith.subf %44, %47 : vector<8x8xf32>
    %49 = math.exp %48 : vector<8x8xf32>
    %cst_19 = arith.constant dense<0.000000e+00> : vector<8xf32>
    %50 = vector.multi_reduction <add>, %49, %cst_19 [1] : vector<8x8xf32> to vector<8xf32>
    %51 = vector.shape_cast %50 : vector<8xf32> to vector<8x1xf32>
    %52 = tpu.reciprocal %51 {approx = true} : vector<8x1xf32> -> vector<8x1xf32>
    %53 = vector.broadcast %52 : vector<8x1xf32> to vector<8x8xf32>
    %54 = arith.mulf %49, %53 : vector<8x8xf32>
    %55 = arith.truncf %54 : vector<8x8xf32> to vector<8x8xbf16>
    %cst_20 = arith.constant dense<0.000000e+00> : vector<8x16xf32>
    %56 = tpu.matmul %55, %43, %cst_20 {dimension_numbers = #tpu.dot_dimension_numbers<[1], [0], [0], [1], [0, 0, 1, 1], [], []>} : vector<8x8xbf16>, vector<8x16xbf16>, vector<8x16xf32> -> vector<8x16xf32>
    %57 = arith.truncf %56 : vector<8x16xf32> to vector<8x16xbf16>
    %c0_21 = arith.constant 0 : index
    %c0_22 = arith.constant 0 : index
    %58 = vector.load %arg6[%c0_21, %c0_22] : memref<64x64xbf16, #tpu.memory_space<vmem>>, vector<16x64xbf16>
    %cst_23 = arith.constant dense<0.000000e+00> : vector<8x64xf32>
    %59 = tpu.matmul %57, %58, %cst_23 {dimension_numbers = #tpu.dot_dimension_numbers<[1], [0], [0], [1], [0, 0, 1, 1], [], []>} : vector<8x16xbf16>, vector<16x64xbf16>, vector<8x64xf32> -> vector<8x64xf32>
    %60 = arith.addf %37, %59 : vector<8x64xf32>
    %61 = vector.extract_strided_slice %34 {offsets = [0, 16], sizes = [8, 16], strides = [1, 1]} : vector<8x64xf32> to vector<8x16xf32>
    %62 = arith.truncf %61 : vector<8x16xf32> to vector<8x16xbf16>
    %63 = vector.extract_strided_slice %35 {offsets = [0, 16], sizes = [8, 16], strides = [1, 1]} : vector<8x64xf32> to vector<8x16xf32>
    %64 = arith.truncf %63 : vector<8x16xf32> to vector<8x16xbf16>
    %65 = vector.extract_strided_slice %36 {offsets = [0, 16], sizes = [8, 16], strides = [1, 1]} : vector<8x64xf32> to vector<8x16xf32>
    %66 = arith.truncf %65 : vector<8x16xf32> to vector<8x16xbf16>
    "tpu.trace_start"() <{level = 10 : i32, message = "qd,kd->qk"}> : () -> ()
    %cst_24 = arith.constant dense<0.000000e+00> : vector<8x8xf32>
    %67 = tpu.matmul %62, %64, %cst_24 {dimension_numbers = #tpu.dot_dimension_numbers<[1], [1], [0], [0], [0, 0, 1, 0], [], []>} : vector<8x16xbf16>, vector<8x16xbf16>, vector<8x8xf32> -> vector<8x8xf32>
    "tpu.trace_stop"() : () -> ()
    %cst_25 = arith.constant dense<0xFF800000> : vector<8xf32>
    %68 = vector.multi_reduction <maximumf>, %67, %cst_25 [1] : vector<8x8xf32> to vector<8xf32>
    %69 = vector.shape_cast %68 : vector<8xf32> to vector<8x1xf32>
    %70 = vector.broadcast %69 : vector<8x1xf32> to vector<8x8xf32>
    %71 = arith.subf %67, %70 : vector<8x8xf32>
    %72 = math.exp %71 : vector<8x8xf32>
    %cst_26 = arith.constant dense<0.000000e+00> : vector<8xf32>
    %73 = vector.multi_reduction <add>, %72, %cst_26 [1] : vector<8x8xf32> to vector<8xf32>
    %74 = vector.shape_cast %73 : vector<8xf32> to vector<8x1xf32>
    %75 = tpu.reciprocal %74 {approx = true} : vector<8x1xf32> -> vector<8x1xf32>
    %76 = vector.broadcast %75 : vector<8x1xf32> to vector<8x8xf32>
    %77 = arith.mulf %72, %76 : vector<8x8xf32>
    %78 = arith.truncf %77 : vector<8x8xf32> to vector<8x8xbf16>
    %cst_27 = arith.constant dense<0.000000e+00> : vector<8x16xf32>
    %79 = tpu.matmul %78, %66, %cst_27 {dimension_numbers = #tpu.dot_dimension_numbers<[1], [0], [0], [1], [0, 0, 1, 1], [], []>} : vector<8x8xbf16>, vector<8x16xbf16>, vector<8x16xf32> -> vector<8x16xf32>
    %80 = arith.truncf %79 : vector<8x16xf32> to vector<8x16xbf16>
    %c16 = arith.constant 16 : index
    %c0_28 = arith.constant 0 : index
    %81 = vector.load %arg6[%c16, %c0_28] : memref<64x64xbf16, #tpu.memory_space<vmem>>, vector<16x64xbf16>
    %cst_29 = arith.constant dense<0.000000e+00> : vector<8x64xf32>
    %82 = tpu.matmul %80, %81, %cst_29 {dimension_numbers = #tpu.dot_dimension_numbers<[1], [0], [0], [1], [0, 0, 1, 1], [], []>} : vector<8x16xbf16>, vector<16x64xbf16>, vector<8x64xf32> -> vector<8x64xf32>
    %83 = arith.addf %60, %82 : vector<8x64xf32>
    %84 = vector.extract_strided_slice %34 {offsets = [0, 32], sizes = [8, 16], strides = [1, 1]} : vector<8x64xf32> to vector<8x16xf32>
    %85 = arith.truncf %84 : vector<8x16xf32> to vector<8x16xbf16>
    %86 = vector.extract_strided_slice %35 {offsets = [0, 32], sizes = [8, 16], strides = [1, 1]} : vector<8x64xf32> to vector<8x16xf32>
    %87 = arith.truncf %86 : vector<8x16xf32> to vector<8x16xbf16>
    %88 = vector.extract_strided_slice %36 {offsets = [0, 32], sizes = [8, 16], strides = [1, 1]} : vector<8x64xf32> to vector<8x16xf32>
    %89 = arith.truncf %88 : vector<8x16xf32> to vector<8x16xbf16>
    "tpu.trace_start"() <{level = 10 : i32, message = "qd,kd->qk"}> : () -> ()
    %cst_30 = arith.constant dense<0.000000e+00> : vector<8x8xf32>
    %90 = tpu.matmul %85, %87, %cst_30 {dimension_numbers = #tpu.dot_dimension_numbers<[1], [1], [0], [0], [0, 0, 1, 0], [], []>} : vector<8x16xbf16>, vector<8x16xbf16>, vector<8x8xf32> -> vector<8x8xf32>
    "tpu.trace_stop"() : () -> ()
    %cst_31 = arith.constant dense<0xFF800000> : vector<8xf32>
    %91 = vector.multi_reduction <maximumf>, %90, %cst_31 [1] : vector<8x8xf32> to vector<8xf32>
    %92 = vector.shape_cast %91 : vector<8xf32> to vector<8x1xf32>
    %93 = vector.broadcast %92 : vector<8x1xf32> to vector<8x8xf32>
    %94 = arith.subf %90, %93 : vector<8x8xf32>
    %95 = math.exp %94 : vector<8x8xf32>
    %cst_32 = arith.constant dense<0.000000e+00> : vector<8xf32>
    %96 = vector.multi_reduction <add>, %95, %cst_32 [1] : vector<8x8xf32> to vector<8xf32>
    %97 = vector.shape_cast %96 : vector<8xf32> to vector<8x1xf32>
    %98 = tpu.reciprocal %97 {approx = true} : vector<8x1xf32> -> vector<8x1xf32>
    %99 = vector.broadcast %98 : vector<8x1xf32> to vector<8x8xf32>
    %100 = arith.mulf %95, %99 : vector<8x8xf32>
    %101 = arith.truncf %100 : vector<8x8xf32> to vector<8x8xbf16>
    %cst_33 = arith.constant dense<0.000000e+00> : vector<8x16xf32>
    %102 = tpu.matmul %101, %89, %cst_33 {dimension_numbers = #tpu.dot_dimension_numbers<[1], [0], [0], [1], [0, 0, 1, 1], [], []>} : vector<8x8xbf16>, vector<8x16xbf16>, vector<8x16xf32> -> vector<8x16xf32>
    %103 = arith.truncf %102 : vector<8x16xf32> to vector<8x16xbf16>
    %c32 = arith.constant 32 : index
    %c0_34 = arith.constant 0 : index
    %104 = vector.load %arg6[%c32, %c0_34] : memref<64x64xbf16, #tpu.memory_space<vmem>>, vector<16x64xbf16>
    %cst_35 = arith.constant dense<0.000000e+00> : vector<8x64xf32>
    %105 = tpu.matmul %103, %104, %cst_35 {dimension_numbers = #tpu.dot_dimension_numbers<[1], [0], [0], [1], [0, 0, 1, 1], [], []>} : vector<8x16xbf16>, vector<16x64xbf16>, vector<8x64xf32> -> vector<8x64xf32>
    %106 = arith.addf %83, %105 : vector<8x64xf32>
    %107 = vector.extract_strided_slice %34 {offsets = [0, 48], sizes = [8, 16], strides = [1, 1]} : vector<8x64xf32> to vector<8x16xf32>
    %108 = arith.truncf %107 : vector<8x16xf32> to vector<8x16xbf16>
    %109 = vector.extract_strided_slice %35 {offsets = [0, 48], sizes = [8, 16], strides = [1, 1]} : vector<8x64xf32> to vector<8x16xf32>
    %110 = arith.truncf %109 : vector<8x16xf32> to vector<8x16xbf16>
    %111 = vector.extract_strided_slice %36 {offsets = [0, 48], sizes = [8, 16], strides = [1, 1]} : vector<8x64xf32> to vector<8x16xf32>
    %112 = arith.truncf %111 : vector<8x16xf32> to vector<8x16xbf16>
    "tpu.trace_start"() <{level = 10 : i32, message = "qd,kd->qk"}> : () -> ()
    %cst_36 = arith.constant dense<0.000000e+00> : vector<8x8xf32>
    %113 = tpu.matmul %108, %110, %cst_36 {dimension_numbers = #tpu.dot_dimension_numbers<[1], [1], [0], [0], [0, 0, 1, 0], [], []>} : vector<8x16xbf16>, vector<8x16xbf16>, vector<8x8xf32> -> vector<8x8xf32>
    "tpu.trace_stop"() : () -> ()
    %cst_37 = arith.constant dense<0xFF800000> : vector<8xf32>
    %114 = vector.multi_reduction <maximumf>, %113, %cst_37 [1] : vector<8x8xf32> to vector<8xf32>
    %115 = vector.shape_cast %114 : vector<8xf32> to vector<8x1xf32>
    %116 = vector.broadcast %115 : vector<8x1xf32> to vector<8x8xf32>
    %117 = arith.subf %113, %116 : vector<8x8xf32>
    %118 = math.exp %117 : vector<8x8xf32>
    %cst_38 = arith.constant dense<0.000000e+00> : vector<8xf32>
    %119 = vector.multi_reduction <add>, %118, %cst_38 [1] : vector<8x8xf32> to vector<8xf32>
    %120 = vector.shape_cast %119 : vector<8xf32> to vector<8x1xf32>
    %121 = tpu.reciprocal %120 {approx = true} : vector<8x1xf32> -> vector<8x1xf32>
    %122 = vector.broadcast %121 : vector<8x1xf32> to vector<8x8xf32>
    %123 = arith.mulf %118, %122 : vector<8x8xf32>
    %124 = arith.truncf %123 : vector<8x8xf32> to vector<8x8xbf16>
    %cst_39 = arith.constant dense<0.000000e+00> : vector<8x16xf32>
    %125 = tpu.matmul %124, %112, %cst_39 {dimension_numbers = #tpu.dot_dimension_numbers<[1], [0], [0], [1], [0, 0, 1, 1], [], []>} : vector<8x8xbf16>, vector<8x16xbf16>, vector<8x16xf32> -> vector<8x16xf32>
    %126 = arith.truncf %125 : vector<8x16xf32> to vector<8x16xbf16>
    %c48 = arith.constant 48 : index
    %c0_40 = arith.constant 0 : index
    %127 = vector.load %arg6[%c48, %c0_40] : memref<64x64xbf16, #tpu.memory_space<vmem>>, vector<16x64xbf16>
    %cst_41 = arith.constant dense<0.000000e+00> : vector<8x64xf32>
    %128 = tpu.matmul %126, %127, %cst_41 {dimension_numbers = #tpu.dot_dimension_numbers<[1], [0], [0], [1], [0, 0, 1, 1], [], []>} : vector<8x16xbf16>, vector<16x64xbf16>, vector<8x64xf32> -> vector<8x64xf32>
    %129 = arith.addf %106, %128 : vector<8x64xf32>
    %c0_42 = arith.constant 0 : index
    %c0_43 = arith.constant 0 : index
    %130 = vector.load %arg7[%c0_42, %c0_43] : memref<1x64xf32, #tpu.memory_space<vmem>>, vector<1x64xf32>
    %131 = vector.broadcast %130 : vector<1x64xf32> to vector<8x64xf32>
    %132 = arith.addf %129, %131 : vector<8x64xf32>
    %133 = arith.addf %1, %132 : vector<8x64xf32>
    %c0_44 = arith.constant 0 : index
    %c0_45 = arith.constant 0 : index
    %134 = vector.load %arg8[%c0_44, %c0_45] : memref<1x64xf32, #tpu.memory_space<vmem>>, vector<1x64xf32>
    %c0_46 = arith.constant 0 : index
    %c0_47 = arith.constant 0 : index
    %135 = vector.load %arg9[%c0_46, %c0_47] : memref<1x64xf32, #tpu.memory_space<vmem>>, vector<1x64xf32>
    %cst_48 = arith.constant dense<0.000000e+00> : vector<8xf32>
    %136 = vector.multi_reduction <add>, %133, %cst_48 [1] : vector<8x64xf32> to vector<8xf32>
    %137 = vector.shape_cast %136 : vector<8xf32> to vector<8x1xf32>
    %cst_49 = arith.constant 6.400000e+01 : f32
    %138 = vector.broadcast %cst_49 : f32 to vector<8x1xf32>
    %139 = arith.divf %137, %138 : vector<8x1xf32>
    %140 = vector.broadcast %139 : vector<8x1xf32> to vector<8x64xf32>
    %141 = arith.subf %133, %140 : vector<8x64xf32>
    %142 = arith.mulf %141, %141 : vector<8x64xf32>
    %cst_50 = arith.constant dense<0.000000e+00> : vector<8xf32>
    %143 = vector.multi_reduction <add>, %142, %cst_50 [1] : vector<8x64xf32> to vector<8xf32>
    %144 = vector.shape_cast %143 : vector<8xf32> to vector<8x1xf32>
    %cst_51 = arith.constant 6.400000e+01 : f32
    %145 = vector.broadcast %cst_51 : f32 to vector<8x1xf32>
    %146 = arith.divf %144, %145 : vector<8x1xf32>
    %147 = vector.broadcast %139 : vector<8x1xf32> to vector<8x64xf32>
    %148 = arith.subf %133, %147 : vector<8x64xf32>
    %cst_52 = arith.constant 9.99999974E-6 : f32
    %149 = vector.broadcast %cst_52 : f32 to vector<8x1xf32>
    %150 = arith.addf %146, %149 : vector<8x1xf32>
    %151 = math.rsqrt %150 : vector<8x1xf32>
    %152 = vector.broadcast %151 : vector<8x1xf32> to vector<8x64xf32>
    %153 = arith.mulf %148, %152 : vector<8x64xf32>
    %154 = vector.broadcast %134 : vector<1x64xf32> to vector<8x64xf32>
    %155 = arith.mulf %153, %154 : vector<8x64xf32>
    %156 = vector.broadcast %135 : vector<1x64xf32> to vector<8x64xf32>
    %157 = arith.addf %155, %156 : vector<8x64xf32>
    %158 = arith.truncf %157 : vector<8x64xf32> to vector<8x64xbf16>
    %c0_53 = arith.constant 0 : index
    %c0_54 = arith.constant 0 : index
    %159 = vector.load %arg10[%c0_53, %c0_54] : memref<64x256xbf16, #tpu.memory_space<vmem>>, vector<64x256xbf16>
    %cst_55 = arith.constant dense<0.000000e+00> : vector<8x256xf32>
    %160 = tpu.matmul %158, %159, %cst_55 {dimension_numbers = #tpu.dot_dimension_numbers<[1], [0], [0], [1], [0, 0, 1, 1], [], []>} : vector<8x64xbf16>, vector<64x256xbf16>, vector<8x256xf32> -> vector<8x256xf32>
    %c0_56 = arith.constant 0 : index
    %c0_57 = arith.constant 0 : index
    %161 = vector.load %arg11[%c0_56, %c0_57] : memref<1x256xf32, #tpu.memory_space<vmem>>, vector<1x256xf32>
    %162 = vector.broadcast %161 : vector<1x256xf32> to vector<8x256xf32>
    %163 = arith.addf %160, %162 : vector<8x256xf32>
    %cst_58 = arith.constant 1.702000e+00 : f32
    %164 = vector.broadcast %cst_58 : f32 to vector<8x256xf32>
    %165 = arith.mulf %164, %163 : vector<8x256xf32>
    %166 = arith.negf %165 : vector<8x256xf32>
    %167 = math.exp %166 : vector<8x256xf32>
    %cst_59 = arith.constant 1.000000e+00 : f32
    %168 = vector.broadcast %cst_59 : f32 to vector<8x256xf32>
    %169 = arith.addf %168, %167 : vector<8x256xf32>
    %170 = arith.divf %168, %169 : vector<8x256xf32>
    %171 = arith.mulf %163, %170 : vector<8x256xf32>
    %172 = arith.truncf %171 : vector<8x256xf32> to vector<8x256xbf16>
    %c0_60 = arith.constant 0 : index
    %c0_61 = arith.constant 0 : index
    %173 = vector.load %arg12[%c0_60, %c0_61] : memref<256x64xbf16, #tpu.memory_space<vmem>>, vector<256x64xbf16>
    %cst_62 = arith.constant dense<0.000000e+00> : vector<8x64xf32>
    %174 = tpu.matmul %172, %173, %cst_62 {dimension_numbers = #tpu.dot_dimension_numbers<[1], [0], [0], [1], [0, 0, 1, 1], [], []>} : vector<8x256xbf16>, vector<256x64xbf16>, vector<8x64xf32> -> vector<8x64xf32>
    %c0_63 = arith.constant 0 : index
    %c0_64 = arith.constant 0 : index
    %175 = vector.load %arg13[%c0_63, %c0_64] : memref<1x64xf32, #tpu.memory_space<vmem>>, vector<1x64xf32>
    %176 = vector.broadcast %175 : vector<1x64xf32> to vector<8x64xf32>
    %177 = arith.addf %174, %176 : vector<8x64xf32>
    %178 = arith.addf %133, %177 : vector<8x64xf32>
    %c0_65 = arith.constant 0 : index
    %c0_66 = arith.constant 0 : index
    %c0_67 = arith.constant 0 : index
    %179 = vector.load %arg14[%c0_65, %c0_66, %c0_67] : memref<1x8x64xf32, #tpu.memory_space<vmem>>, vector<1x8x64xf32>
    %180 = vector.shape_cast %179 : vector<1x8x64xf32> to vector<8x64xf32>
    %181 = vector.shape_cast %178 : vector<8x64xf32> to vector<1x8x64xf32>
    tpu.vector_store %arg14[%c0_65, %c0_66, %c0_67], %181 {strides = array<i32>} : memref<1x8x64xf32, #tpu.memory_space<vmem>>, vector<1x8x64xf32>,
    return
  }
  func.func @transform_0(%arg0: i32) -> (i32, i32, i32) {
    %c0_i32 = arith.constant 0 : i32
    %c0_i32_0 = arith.constant 0 : i32
    %c0_i32_1 = arith.constant 0 : i32
    return %arg0, %c0_i32, %c0_i32_0 : i32, i32, i32
  }
  func.func @transform_1(%arg0: i32) -> (i32, i32) {
    %c0_i32 = arith.constant 0 : i32
    %c0_i32_0 = arith.constant 0 : i32
    %c0_i32_1 = arith.constant 0 : i32
    return %c0_i32, %c0_i32_0 : i32, i32
  }
  func.func @transform_2(%arg0: i32) -> (i32, i32) {
    %c0_i32 = arith.constant 0 : i32
    %c0_i32_0 = arith.constant 0 : i32
    %c0_i32_1 = arith.constant 0 : i32
    return %c0_i32, %c0_i32_0 : i32, i32
  }
  func.func @transform_3(%arg0: i32) -> (i32, i32) {
    %c0_i32 = arith.constant 0 : i32
    %c0_i32_0 = arith.constant 0 : i32
    %c0_i32_1 = arith.constant 0 : i32
    return %c0_i32, %c0_i32_0 : i32, i32
  }
  func.func @transform_4(%arg0: i32) -> (i32, i32) {
    %c0_i32 = arith.constant 0 : i32
    %c0_i32_0 = arith.constant 0 : i32
    %c0_i32_1 = arith.constant 0 : i32
    return %c0_i32, %c0_i32_0 : i32, i32
  }
  func.func @transform_5(%arg0: i32) -> (i32, i32) {
    %c0_i32 = arith.constant 0 : i32
    %c0_i32_0 = arith.constant 0 : i32
    %c0_i32_1 = arith.constant 0 : i32
    return %c0_i32, %c0_i32_0 : i32, i32
  }
  func.func @transform_6(%arg0: i32) -> (i32, i32) {
    %c0_i32 = arith.constant 0 : i32
    %c0_i32_0 = arith.constant 0 : i32
    %c0_i32_1 = arith.constant 0 : i32
    return %c0_i32, %c0_i32_0 : i32, i32
  }
  func.func @transform_7(%arg0: i32) -> (i32, i32) {
    %c0_i32 = arith.constant 0 : i32
    %c0_i32_0 = arith.constant 0 : i32
    %c0_i32_1 = arith.constant 0 : i32
    return %c0_i32, %c0_i32_0 : i32, i32
  }
  func.func @transform_8(%arg0: i32) -> (i32, i32) {
    %c0_i32 = arith.constant 0 : i32
    %c0_i32_0 = arith.constant 0 : i32
    %c0_i32_1 = arith.constant 0 : i32
    return %c0_i32, %c0_i32_0 : i32, i32
  }
  func.func @transform_9(%arg0: i32) -> (i32, i32) {
    %c0_i32 = arith.constant 0 : i32
    %c0_i32_0 = arith.constant 0 : i32
    %c0_i32_1 = arith.constant 0 : i32
    return %c0_i32, %c0_i32_0 : i32, i32
  }
  func.func @transform_10(%arg0: i32) -> (i32, i32) {
    %c0_i32 = arith.constant 0 : i32
    %c0_i32_0 = arith.constant 0 : i32
    %c0_i32_1 = arith.constant 0 : i32
    return %c0_i32, %c0_i32_0 : i32, i32
  }
  func.func @transform_11(%arg0: i32) -> (i32, i32) {
    %c0_i32 = arith.constant 0 : i32
    %c0_i32_0 = arith.constant 0 : i32
    %c0_i32_1 = arith.constant 0 : i32
    return %c0_i32, %c0_i32_0 : i32, i32
  }
  func.func @transform_12(%arg0: i32) -> (i32, i32) {
    %c0_i32 = arith.constant 0 : i32
    %c0_i32_0 = arith.constant 0 : i32
    %c0_i32_1 = arith.constant 0 : i32
    return %c0_i32, %c0_i32_0 : i32, i32
  }
  func.func @transform_13(%arg0: i32) -> (i32, i32, i32) {
    %c0_i32 = arith.constant 0 : i32
    %c0_i32_0 = arith.constant 0 : i32
    %c0_i32_1 = arith.constant 0 : i32
    return %arg0, %c0_i32, %c0_i32_0 : i32, i32, i32
  }
}

</mosaic_0001>

<bundles_post_ra>
// kernel: transformer_forward.3
= control target key start
LH: loop header
LB: loop body
LE: loop exit
PB: predicated region body
PF: predicated region fallthrough
CT: control target
= control target key end

     0   :  { %s2447_s0 = inlined_call_operand.vmem [shape: f32[2,8,64], index: 0, kind: input, shape index: {}]   ;;  %s2448_s1 = inlined_call_operand.vmem [shape: f32[1,64], index: 1, kind: input, shape index: {}]   ;;  %s2449_s2 = inlined_call_operand.vmem [shape: f32[1,64], index: 2, kind: input, shape index: {}]   ;;  %s2450_s3 = inlined_call_operand.vmem [shape: bf16[64,192], index: 3, kind: input, shape index: {}]   ;;  %s2451_s4 = inlined_call_operand.vmem [shape: f32[1,192], index: 4, kind: input, shape index: {}]   ;;  %s2452_s5 = inlined_call_operand.vmem [shape: bf16[64,64], index: 5, kind: input, shape index: {}]   ;;  %s2453_s6 = inlined_call_operand.vmem [shape: f32[1,64], index: 6, kind: input, shape index: {}]   ;;  %s2454_s7 = inlined_call_operand.vmem [shape: f32[1,64], index: 7, kind: input, shape index: {}]   ;;  %s2455_s8 = inlined_call_operand.vmem [shape: f32[1,64], index: 8, kind: input, shape index: {}]   ;;  %s2456_s9 = inlined_call_operand.vmem [shape: bf16[64,256], index: 9, kind: input, shape index: {}]   ;;  %s2457_s10 = inlined_call_operand.vmem [shape: f32[1,256], index: 10, kind: input, shape index: {}]   ;;  %s2458_s11 = inlined_call_operand.vmem [shape: bf16[256,64], index: 11, kind: input, shape index: {}]   ;;  %s2459_s12 = inlined_call_operand.vmem [shape: f32[1,64], index: 12, kind: input, shape index: {}]   ;;  %s2460_s13 = inlined_call_operand.hbm [shape: f32[2,8,64], index: 13, kind: output, shape index: {}]  }
   0x1   :  { %2461 = sst [smem:[#allocation5_spill]] %s2447_s0 }
   0x2   :  { %2462 = sst [smem:[#allocation6_spill]] %s2448_s1 }
   0x3   :  { %2463 = sst [smem:[#allocation7_spill]] %s2449_s2 }
   0x4   :  { %18 = vsyncpa [#allocation3], 0 }
   0x5   :  { %20 = vsyncpa [#allocation3 + $0x1], 0  ;;  %s2093_s25 = smov 0   ;;  %s2095_s26 = smov 0  }
   0x6   :  { %s2097_s27 = smov 0   ;;  %s2099_s28 = smov 0  }
   0x7 LB: > { %s2114_s29 = sadd.s32 4294967295, %s2010_s28   ;;  %s1641_s30 = sadd.s32 4294967294, %s2010_s28   ;;  %s2010_s28 = sphi %s2099_s28, %s2472_s28   ;;  %s2006_s27 = sphi %s2097_s27, %s2471_s27   ;;  %s2002_s26 = sphi %s2095_s26, %s2470_s26   ;;  %s1998_s25 = sphi %s2093_s25, %s2469_s25  }
   0x8   : > { %s2118_s14 = sadd.s32 1, %s2010_s28   ;;  %s311_s15 = sadd.s32 1, %s2006_s27 }
   0x9   : > { %s308_s16 = ssub.s32 %s2010_s28, %s2118_s14  ;;  %p321_p0 = scmp.ne.s32.totalorder %s2006_s27, %s2002_s26 }
   0xa   : > { %p309_p1 = scmp.eq.s32.totalorder %s308_s16, 0  ;;  %p322_p2 = scmp.eq.s32.totalorder %s2114_s29, 1 }
   0xb   : > { %p327_p3 = scmp.ne.s32.totalorder %s2002_s26, %s1998_s25  ;;  %p328_p4 = scmp.eq.s32.totalorder %s1641_s30, 1 }
   0xc   : > { %s2129_s17 = scalar_select %p309_p1, %s2006_s27, %s311_s15  }
   0xd   : > { %p2131_p5 = por %p322_p2, %p321_p0  ;;  %p2135_p6 = por %p328_p4, %p327_p3 }
   0xe   : > { %p1644_p7 = scmp.ge.s32.totalorder %s2010_s28, 1  ;;  %p389_p8 = scmp.lt.s32.totalorder %s2010_s28, 3 }
  0x10   : > { %p390_p9 = pnand %p1644_p7, %p389_p8 }
  0x11   : > { %p432_p10 = scmp.lt.s32.totalorder (!%p390_p9), %s2114_s29, 1  ;;  %vm440_vm0 = vcmask (!%p390_p9), 523264   ;;  %s2466_s0 = sld [smem:[#allocation5_spill]] (!%p390_p9)  ;;  %v1876_v7 = vld [vmem:[%s2450_s3 + $0x4] ss:$8 sps:$4 sm:$0xff] (!%p390_p9)   ;;  %v2012_v11 = vmov (!%p390_p9), 0   ;;  %v480_v27 = vlaneseq (!%p390_p9) }
  0x12   : > { %393 = sbr.rel (%p390_p9) target bundleno = 3734 (0xe96), region = 72  ;;  %v1878_v8 = vld [vmem:[%s2450_s3] ss:$8 sps:$4 sm:$0xff] (!%p390_p9)   ;;  %v1879_v9 = vld [vmem:[%s2450_s3 + $0x14] ss:$8 sps:$4 sm:$0xff] (!%p390_p9)   ;;  %533 = vmatprep.subr.bf16.mxu0 (!%p390_p9), %v1876_v7  ;;  %565 = vmatprep.mubr.bf16.mxu0 (!%p390_p9), %v2012_v11  ;;  %s2467_s1 = sld [smem:[#allocation6_spill]] (!%p390_p9) }
  0x13   : > { %534 = vmatpush1.bf16.msra.mxu0 (!%p390_p9), %v1878_v8  ;;  %v1881_v10 = vld [vmem:[%s2450_s3 + $0x10] ss:$8 sps:$4 sm:$0xff] (!%p390_p9)   ;;  %v1882_v12 = vld [vmem:[%s2450_s3 + $0x24] ss:$8 sps:$4 sm:$0xff] (!%p390_p9)   ;;  %v1884_v13 = vld [vmem:[%s2450_s3 + $0x20] ss:$8 sps:$4 sm:$0xff] (!%p390_p9)  }
  0x14   : > { %535 = vmatprep.subr.bf16.mxu0 (!%p390_p9), %v1879_v9  ;;  %v1885_v14 = vld [vmem:[%s2450_s3 + $0x34] ss:$8 sps:$4 sm:$0xff] (!%p390_p9)   ;;  %v1887_v15 = vld [vmem:[%s2450_s3 + $0x30] ss:$8 sps:$4 sm:$0xff] (!%p390_p9)   ;;  %s2468_s2 = sld [smem:[#allocation7_spill]] (!%p390_p9)  ;;  %v2013_v26 = vmov (!%p390_p9), 0.0  }
  0x15   : > { %1761 = vmatprep.subr.bf16.mxu1 (!%p390_p9), %v2013_v26  ;;  %v2186_v28 = vshrl.u32 (!%p390_p9), %v480_v27, 7  ;;  %v478_v30 = vld [vmem:[%s2451_s4] sm:$0x3] (!%p390_p9)  ;;  %vm2014_vm1 = vmmov (!%p390_p9), 0   ;;  %vm644_vm2 = vcmask (!%p390_p9), 1043456   ;;  %s2015_s23 = smov (!%p390_p9), 64  }
  0x16   : > { %1763 = vmatprep.mubr.msk.bf16.mxu1 (!%p390_p9), %vm2014_vm1, %v2013_v26  ;;  %s2017_s30 = smov (!%p390_p9), 48   ;;  %vm581_vm3 = vcmask (!%p390_p9), 130048   ;;  %vm628_vm4 = vcmask (!%p390_p9), 64512   ;;  %s2018_s15 = smov (!%p390_p9), 32  }
  0x17   : > { %536 = vmatpush1.bf16.msra.mxu0 (!%p390_p9), %v1881_v10  ;;  %v482_v29 = vsub.s32 (!%p390_p9), 0, %v2186_v28  ;;  %v486_v31 = vsub.s32 (!%p390_p9), 1, %v2186_v28  ;;  %s2019_s16 = smov (!%p390_p9), 96   ;;  %s1706_s22 = sshll.u32 (!%p390_p9), %s2114_s29, 7 }
  0x18   : > { %537 = vmatprep.subr.bf16.mxu0 (!%p390_p9), %v1882_v12  ;;  %v1647_v20 = vld [vmem:[%s2467_s1] ss:$0 sm:$0xff] (!%p390_p9) }
  0x19   : > { %s433_s20 = scalar_select %p432_p10, %s2114_s29, 1  ;;  %v483_v32 = vrot.slane %v478_v30, %v482_v29  ;;  %v487_v33 = vrot.slane %v478_v30, %v486_v31 }
  0x1a   : > { %v1648_v22 = vld [vmem:[%s2468_s2] ss:$0 sm:$0xff]  ;;  %s2022_s29 = smov [#allocation2]  }
  0x1b   : > { %s1646_s21 = sshll.u32 %s433_s20, 3  ;;  %538 = vmatpush1.bf16.msra.mxu0 %v1884_v13  ;;  %s429_s20 = sand.u32 1, %s2002_s26  }
  0x1c   : > { %s435_s24 = scalar_lea.vmem %s2466_s0, %s1646_s21  ;;  %539 = vmatprep.subr.bf16.mxu0 %v1885_v14  ;;  %s1645_s21 = sshll.u32 %s429_s20, 3 }
  0x1d   : > { %v2146_v0 = vld [vmem:[%s435_s24] sm:$0xff]  ;;  %s2016_s24 = smov 112   ;;  %s1569_s0 = scalar_lea.sflag [#allocation3], %s429_s20 }
  0x1e   : > { %v441_v1 = vsel %vm440_vm0, %v2146_v0, 0.0 }
  0x1f   : > { %442 = vadd.xlane.f32.xlu0 %v441_v1  ;;  %540 = vmatpush1.bf16.msra.mxu0 %v1887_v15 }
  0x20   : > { %1755 = vmatprep.subr.bf16.mxu0 %v2013_v26 }
  0xac   : > { %v443_v2 = vpop.xlane.xlu0 %442 }
  0xad   : > { %v445_v3 = vmul.f32 0.015625, %v443_v2 }
  0xaf   : > { %v446_v4 = vsub.f32 %v2146_v0, %v445_v3 }
  0xb1   : > { %v447_v5 = vmul.f32 %v446_v4, %v446_v4 }
  0xb3   : > { %v448_v6 = vsel %vm440_vm0, %v447_v5, 0.0 }
  0xb4   : > { %449 = vadd.xlane.f32.xlu0 %v448_v6 }
 0x141   : > { %v450_v16 = vpop.xlane.xlu0 %449 }
 0x142   : > { %v451_v17 = vmul.f32 0.015625, %v450_v16 }
 0x144   : > { %v452_v18 = vadd.f32 1e-05, %v451_v17 }
 0x146   : > { %1920 = vrsqrt.f32 %v452_v18  ;;  %v1888_v18 = vld [vmem:[%s2452_s5] sm:$0xff]  }
 0x150   : > { %v1921_v19 = vpop.eup %1920 }
 0x151   : > { %v454_v21 = vmul.f32 %v1921_v19, %v446_v4  ;;  %v1889_v19 = vld [vmem:[%s2452_s5 + $0x8] sm:$0xff]  }
 0x153   : > { %v461_v23 = vmul.f32 %v1647_v20, %v454_v21 }
 0x155   : > { %v468_v24 = vadd.f32 %v1648_v22, %v461_v23 }
 0x157   : > { %v469_v25 = vpack.c.bf16 %v468_v24, %v468_v24 }
 0x159   : > { %1657 = vmatmul.mubr.msk.bf16.vlgmr.msra.gmra.mrb[0].mxu0 %vm440_vm0, %v469_v25 }
 0x15a   : > { %1757 = vmatprep.mubr.msk.bf16.mxu0 %vm2014_vm1, %v2013_v26 }
 0x22c   : > { %v567_v34 = vpop.f32.mrb[0].mxu0 }
 0x22d   : > { %v568_v35 = vadd.f32 %v567_v34, %v483_v32  ;;  %v569_v36 = vpop.f32.mrb[1].mxu0 }
 0x22e   : > { %v570_v37 = vadd.f32 %v569_v36, %v487_v33  ;;  %v571_v38 = vpop.f32.mrb[2].mxu0 }
 0x22f   : > { %v574_v39 = vmul.f32 0.25, %v568_v35  ;;  %v2201_v40 = vpack.c.bf16 %v568_v35, %v568_v35  ;;  %v572_v41 = vpop.f32.mrb[3].mxu0 }
 0x230   : > { %v2203_v42 = vpack.c.bf16 %v570_v37, %v570_v37 }
 0x231   : > { %v2205_v43 = vpack.c.bf16 %v574_v39, %v574_v39  ;;  %579 = vrot.lane.b32.xlu1 %v2201_v40, %s2015_s23  ;;  %s431_s23 = scalar_lea.vmem [#allocation2], %s1645_s21  ;;  %s1952_s21 = sshll.u32 %s2022_s29, 4  ;;  %s1953_s21 = int_to_ptr.vmem [resolvable:$false] %s1952_s21 }
 0x232   : > { %v646_v44 = vsel %vm644_vm2, %v2203_v42, 0  ;;  %s1954_s2 = scalar_lea.vmem %s1953_s21, 256 }
 0x233   : > { %1762 = vmatpush3.bf16.msra.mxu1 %v646_v44  ;;  %692 = vrot.lane.b32.xlu0 %v2205_v43, %s2016_s24 }
 0x234   : > { %1773 = vmatprep.subr.bf16.mxu1 %v2013_v26 }
 0x235   : > { %694 = vrot.lane.b32.xlu1 %v2201_v40, %s2017_s30  ;;  %s2021_s30 = smov 16  }
 0x2a3   : > { %v580_v45 = vpop.permute.xlu1 %579 }
 0x2a4   : > { %v586_v46 = vsel %vm581_vm3, %v580_v45, 0 }
 0x2a5   : > { %1756 = vmatpush3.bf16.xpose.msra.mxu0 %v586_v46  ;;  %v693_v49 = vpop.permute.xlu0 %692 }
 0x2a6   : > { %1767 = vmatprep.subr.bf16.mxu0 %v2013_v26 }
 0x2a7   : > { %v695_v47 = vpop.permute.xlu1 %694 }
 0x2a8   : > { %v700_v48 = vsel %vm581_vm3, %v695_v47, 0 }
 0x2ac   : > { %1758 = vmatmul.mubr.msk.bf16.vlgmr.msra.gmra.mrb[4].mxu0 %vm581_vm3, %v2205_v43 }
 0x2ad   : > { %1768 = vmatpush3.bf16.xpose.msra.mxu0 %v700_v48  ;;  %1769 = vmatprep.mubr.msk.bf16.mxu0 %vm2014_vm1, %v2013_v26 }
 0x2ae   : > { %1779 = vmatprep.subr.bf16.mxu0 %v2013_v26 }
 0x2b4   : > { %1770 = vmatmul.mubr.msk.bf16.vlgmr.msra.gmra.mrb[8].mxu0 %vm581_vm3, %v693_v49 }
 0x2b5   : > { %1781 = vmatprep.mubr.msk.bf16.mxu0 %vm2014_vm1, %v2013_v26  ;;  %1780 = vmatpush3.bf16.msra.mxu0 %v1889_v19 }
 0x2b6   : > { %1791 = vmatprep.subr.bf16.mxu0 %v2013_v26 }
 0x37f   : > { %v622_v50 = vpop.f32.mrb[4].mxu0 }
 0x380   : > { %v1759_v51 = vpop.f32.mrb[5].mxu0  ;;  %v629_v52 = vsel %vm628_vm4, %v622_v50, -inf }
 0x381   : > { %630 = vmax.xlane.f32.xlu1 %v629_v52  ;;  %v625_v53 = vpop.f32.mrb[6].mxu0 }
 0x382   : > { %v1760_v54 = vpop.f32.mrb[7].mxu0 }
 0x387   : > { %v736_v55 = vpop.f32.mrb[8].mxu0 }
 0x388   : > { %v1771_v56 = vpop.f32.mrb[9].mxu0  ;;  %v742_v57 = vsel %vm628_vm4, %v736_v55, -inf }
 0x389   : > { %743 = vmax.xlane.f32.xlu0 %v742_v57  ;;  %v739_v58 = vpop.f32.mrb[10].mxu0 }
 0x38a   : > { %v1772_v59 = vpop.f32.mrb[11].mxu0 }
 0x39f   : > { %906 = vrot.lane.b32.xlu0 %v2201_v40, %s2018_s15 }
 0x40e   : > { %v631_v60 = vpop.xlane.xlu1 %630 }
 0x40f   : > { %v632_v61 = vsub.f32 %v622_v50, %v631_v60 }
 0x411   : > { %v633_v62 = vmul.f32 1.442695, %v632_v61 }
 0x413   : > { %1922 = vpow2.f32 %v633_v62 }
 0x416   : > { %v744_v63 = vpop.xlane.xlu0 %743 }
 0x417   : > { %v745_v1 = vsub.f32 %v736_v55, %v744_v63 }
 0x419   : > { %v746_v2 = vmul.f32 1.442695, %v745_v1 }
 0x41a   : > { %v907_v25 = vpop.permute.xlu0 %906 }
 0x41b   : > { %1924 = vpow2.f32 %v746_v2  ;;  %v912_v34 = vsel %vm581_vm3, %v907_v25, 0 }
 0x41d   : > { %v1923_v3 = vpop.eup %1922 }
 0x41e   : > { %v635_v4 = vsel %vm628_vm4, %v1923_v3, 0.0 }
 0x41f   : > { %636 = vadd.xlane.f32.xlu1 %v635_v4 }
 0x425   : > { %v1925_v5 = vpop.eup %1924 }
 0x426   : > { %v748_v6 = vsel %vm628_vm4, %v1925_v5, 0.0 }
 0x427   : > { %749 = vadd.xlane.f32.xlu1 %v748_v6 }
 0x438   : > { %755 = vrot.lane.b32.xlu1 %v2203_v42, %s2016_s24  ;;  %s2020_s24 = smov 80  }
 0x43c   : > { %904 = vrot.lane.b32.xlu1 %v2205_v43, %s2019_s16 }
 0x4ac   : > { %v637_v7 = vpop.xlane.xlu1 %636 }
 0x4ad   : > { %1926 = vrcp.f32 %v637_v7 }
 0x4b4   : > { %v750_v8 = vpop.xlane.xlu1 %749 }
 0x4b5   : > { %1928 = vrcp.f32 %v750_v8 }
 0x4b7   : > { %v1927_v9 = vpop.eup %1926 }
 0x4b8   : > { %v639_v10 = vmul.f32 %v1927_v9, %v1923_v3  ;;  %v756_v12 = vpop.permute.xlu1 %755 }
 0x4b9   : > { %v761_v14 = vsel %vm644_vm2, %v756_v12, 0 }
 0x4ba   : > { %v640_v13 = vpack.c.bf16 %v639_v10, %v639_v10 }
 0x4bc   : > { %1764 = vmatmul.mubr.msk.bf16.vlgmr.msra.gmra.mrb[0].mxu1 %vm628_vm4, %v640_v13  ;;  %v905_v36 = vpop.permute.xlu1 %904 }
 0x4bd   : > { %1774 = vmatpush3.bf16.msra.mxu1 %v761_v14  ;;  %1775 = vmatprep.mubr.msk.bf16.mxu1 %vm2014_vm1, %v2013_v26 }
 0x4be   : > { %1785 = vmatprep.subr.bf16.mxu1 %v2013_v26 }
 0x4bf   : > { %v1929_v15 = vpop.eup %1928 }
 0x4c0   : > { %v752_v16 = vmul.f32 %v1929_v15, %v1925_v5 }
 0x4c2   : > { %v753_v17 = vpack.c.bf16 %v752_v16, %v752_v16 }
 0x4c4   : > { %1776 = vmatmul.mubr.msk.bf16.vlgmr.msra.gmra.mrb[4].mxu1 %vm628_vm4, %v753_v17 }
 0x4c5   : > { %1787 = vmatprep.mubr.msk.bf16.mxu1 %vm2014_vm1, %v2013_v26  ;;  %1786 = vmatpush3.bf16.msra.mxu1 %v1888_v18 }
 0x4c6   : > { %1797 = vmatprep.subr.bf16.mxu1 %v2013_v26 }
 0x58f   : > { %v682_v20 = vpop.f32.mrb[0].mxu1 }
 0x590   : > { %v688_v21 = vpack.c.bf16 %v682_v20, %v682_v20  ;;  %v1765_v22 = vpop.f32.mrb[1].mxu1 }
 0x591   : > { %v685_v23 = vpop.f32.mrb[2].mxu1 }
 0x592   : > { %v1766_v24 = vpop.f32.mrb[3].mxu1  ;;  %1788 = vmatmul.mubr.msk.bf16.vlgmr.msra.gmra.mrb[8].mxu1 %vm581_vm3, %v688_v21  ;;  %v1891_v21 = vld [vmem:[%s2452_s5 + $0x18] sm:$0xff]  }
 0x593   : > { %1799 = vmatprep.mubr.msk.bf16.mxu1 %vm2014_vm1, %v2013_v26 }
 0x597   : > { %v797_v27 = vpop.f32.mrb[4].mxu1 }
 0x598   : > { %v803_v30 = vpack.c.bf16 %v797_v27, %v797_v27  ;;  %v1777_v32 = vpop.f32.mrb[5].mxu1 }
 0x599   : > { %v800_v33 = vpop.f32.mrb[6].mxu1 }
 0x59a   : > { %v1778_v35 = vpop.f32.mrb[7].mxu1  ;;  %1782 = vmatmul.mubr.msk.bf16.vlgmr.msra.gmra.mrb[12].mxu0 %vm581_vm3, %v803_v30 }
 0x59b   : > { %1792 = vmatpush3.bf16.xpose.msra.mxu0 %v912_v34  ;;  %1793 = vmatprep.mubr.msk.bf16.mxu0 %vm2014_vm1, %v2013_v26 }
 0x59c   : > { %1803 = vmatprep.subr.bf16.mxu0 %v2013_v26 }
 0x5a2   : > { %1794 = vmatmul.mubr.msk.bf16.vlgmr.msra.gmra.mrb[16].mxu0 %vm581_vm3, %v905_v36 }
 0x5a3   : > { %1805 = vmatprep.mubr.msk.bf16.mxu0 %vm2014_vm1, %v2013_v26 }
 0x665   : > { %v898_v37 = vpop.f32.mrb[8].mxu1 }
 0x666   : > { %v1789_v38 = vpop.f32.mrb[9].mxu1 }
 0x667   : > { %v901_v39 = vpop.f32.mrb[10].mxu1 }
 0x668   : > { %v1790_v41 = vpop.f32.mrb[11].mxu1 }
 0x669   : > { %v1674_v41 = vld [vmem:[%s2453_s6] ss:$0 sm:$0xff] }
 0x66d   : > { %v849_v44 = vpop.f32.mrb[12].mxu0 }
 0x66e   : > { %v2261_v45 = vadd.f32 %v898_v37, %v849_v44  ;;  %v1783_v46 = vpop.f32.mrb[13].mxu0 }
 0x66f   : > { %v852_v47 = vpop.f32.mrb[14].mxu0 }
 0x670   : > { %v1784_v48 = vpop.f32.mrb[15].mxu0 }
 0x675   : > { %v948_v49 = vpop.f32.mrb[16].mxu0 }
 0x676   : > { %v1795_v50 = vpop.f32.mrb[17].mxu0  ;;  %v954_v51 = vsel %vm628_vm4, %v948_v49, -inf }
 0x677   : > { %955 = vmax.xlane.f32.xlu1 %v954_v51  ;;  %v951_v52 = vpop.f32.mrb[18].mxu0 }
 0x678   : > { %v1796_v53 = vpop.f32.mrb[19].mxu0 }
 0x688   : > { %966 = vrot.lane.b32.xlu1 %v2203_v42, %s2019_s16  ;;  %s2404_s16 = scalar_lea.hbm %s2460_s13, %s1706_s22 }
 0x68c   : > { %1067 = vrot.lane.b32.xlu1 %v2205_v43, %s2020_s24 }
 0x704   : > { %v956_v54 = vpop.xlane.xlu1 %955 }
 0x705   : > { %v957_v55 = vsub.f32 %v948_v49, %v956_v54 }
 0x707   : > { %v958_v56 = vmul.f32 1.442695, %v957_v55  ;;  %v1894_v55 = vld [vmem:[%s2456_s9 + $0x4] ss:$8 sps:$4 sm:$0xff]  }
 0x708   : > { %v967_v57 = vpop.permute.xlu1 %966 }
 0x709   : > { %1930 = vpow2.f32 %v958_v56  ;;  %v972_v58 = vsel %vm644_vm2, %v967_v57, 0  ;;  %v1897_v56 = vld [vmem:[%s2456_s9 + $0x14] ss:$8 sps:$4 sm:$0xff]   ;;  %v1895_v57 = vld [vmem:[%s2456_s9 + $0x10] ss:$8 sps:$4 sm:$0xff]  }
 0x70a   : > { %1798 = vmatpush3.bf16.msra.mxu1 %v972_v58  ;;  %v1900_v58 = vld [vmem:[%s2456_s9 + $0x24] ss:$8 sps:$4 sm:$0xff]  }
 0x70b   : > { %1809 = vmatprep.subr.bf16.mxu1 %v2013_v26 }
 0x70c   : > { %v1068_v3 = vpop.permute.xlu1 %1067 }
 0x713   : > { %v1931_v59 = vpop.eup %1930 }
 0x714   : > { %v960_v60 = vsel %vm628_vm4, %v1931_v59, 0.0 }
 0x715   : > { %961 = vadd.xlane.f32.xlu0 %v960_v60  ;;  %v1901_v60 = vld [vmem:[%s2456_s9 + $0x30] ss:$8 sps:$4 sm:$0xff]  }
 0x72b   : > { %1069 = vrot.lane.b32.xlu0 %v2201_v40, %s2021_s30  ;;  %v1890_v40 = vld [vmem:[%s2452_s5 + $0x10] sm:$0xff]  }
 0x72c   : > { %1804 = vmatpush3.bf16.msra.mxu0 %v1890_v40  ;;  %v1676_v40 = vld [vmem:[%s2455_s8] ss:$0 sm:$0xff] }
 0x72d   : > { %1815 = vmatprep.subr.bf16.mxu0 %v2013_v26 }
 0x7a2   : > { %v962_v61 = vpop.xlane.xlu0 %961 }
 0x7a3   : > { %1932 = vrcp.f32 %v962_v61  ;;  %v1903_v61 = vld [vmem:[%s2456_s9 + $0x34] ss:$8 sps:$4 sm:$0xff]  }
 0x7a6   : > { %v1070_v63 = vpop.permute.xlu0 %1069 }
 0x7a7   : > { %v1075_v2 = vsel %vm581_vm3, %v1070_v63, 0 }
 0x7ad   : > { %v1933_v43 = vpop.eup %1932 }
 0x7ae   : > { %v964_v62 = vmul.f32 %v1933_v43, %v1931_v59  ;;  %v1898_v59 = vld [vmem:[%s2456_s9 + $0x20] ss:$8 sps:$4 sm:$0xff]  }
 0x7b0   : > { %v965_v1 = vpack.c.bf16 %v964_v62, %v964_v62 }
 0x7b2   : > { %1800 = vmatmul.mubr.msk.bf16.vlgmr.msra.gmra.mrb[12].mxu1 %vm628_vm4, %v965_v1 }
 0x7b3   : > { %1810 = vmatpush3.bf16.xpose.msra.mxu1 %v1075_v2  ;;  %1811 = vmatprep.mubr.msk.bf16.mxu1 %vm2014_vm1, %v2013_v26  ;;  %v1675_v2 = vld [vmem:[%s2454_s7] ss:$0 sm:$0xff] }
 0x7b4   : > { %1821 = vmatprep.subr.bf16.mxu1 %v2013_v26 }
 0x7ba   : > { %1812 = vmatmul.mubr.msk.bf16.vlgmr.msra.gmra.mrb[16].mxu1 %vm581_vm3, %v1068_v3 }
 0x7bb   : > { %1823 = vmatprep.mubr.msk.bf16.mxu1 %vm2014_vm1, %v2013_v26  ;;  %1822 = vmatpush3.bf16.msra.mxu1 %v1891_v21  ;;  %v1918_v21 = vld [vmem:[%s2458_s11 + $0x78] sm:$0xff]  }
 0x885   : > { %v1008_v4 = vpop.f32.mrb[12].mxu1 }
 0x886   : > { %v1014_v5 = vpack.c.bf16 %v1008_v4, %v1008_v4  ;;  %v1801_v6 = vpop.f32.mrb[13].mxu1 }
 0x887   : > { %v1011_v7 = vpop.f32.mrb[14].mxu1 }
 0x888   : > { %v1802_v8 = vpop.f32.mrb[15].mxu1  ;;  %1806 = vmatmul.mubr.msk.bf16.vlgmr.msra.gmra.mrb[20].mxu0 %vm581_vm3, %v1014_v5  ;;  %v1904_v7 = vld [vmem:[%s2458_s11 + $0x40] sm:$0xff]  }
 0x889   : > { %1817 = vmatprep.mubr.msk.bf16.mxu0 %vm2014_vm1, %v2013_v26  ;;  %v1905_v8 = vld [vmem:[%s2458_s11] sm:$0xff]   ;;  %1733 = vmatprep.subr.bf16.mxu1 %v1904_v7 }
 0x88d   : > { %v1111_v9 = vpop.f32.mrb[16].mxu1 }
 0x88e   : > { %v1813_v10 = vpop.f32.mrb[17].mxu1  ;;  %v1117_v12 = vsel %vm628_vm4, %v1111_v9, -inf }
 0x88f   : > { %1118 = vmax.xlane.f32.xlu1 %v1117_v12  ;;  %v1114_v13 = vpop.f32.mrb[18].mxu1  ;;  %v1907_v10 = vld [vmem:[%s2458_s11 + $0x8] sm:$0xff]   ;;  %v1908_v12 = vld [vmem:[%s2458_s11 + $0x50] sm:$0xff]  }
 0x890   : > { %v1814_v14 = vpop.f32.mrb[19].mxu1  ;;  %v1909_v13 = vld [vmem:[%s2458_s11 + $0x10] sm:$0xff]  }
 0x891   : > { %v1910_v14 = vld [vmem:[%s2458_s11 + $0x58] sm:$0xff]  }
 0x8a0   : > { %1129 = vrot.lane.b32.xlu1 %v2203_v42, %s2020_s24  ;;  %s1582_s24 = sshll.u32 %s431_s23, 4  ;;  %s2406_s24 = int_to_ptr.vmem [resolvable:$true] %s1582_s24 }
 0x8a1   : > { %s1948_s1 = scalar_lea.vmem %s2406_s24, 128  ;;  %p1955_p0 = scmp.lt.s32.totalorder %s2406_s24, %s1953_s21 }
 0x8a2   : > { %p1949_p11 = scmp.ne.s32.totalorder %s2406_s24, %s1948_s1  ;;  %p1956_p1 = scmp.lt.s32.totalorder %s1954_s2, %s1948_s1 }
 0x8a4   : > { %p1950_p12 = pnand %p1949_p11, %p2131_p5  ;;  %p1957_p2 = por %p1956_p1, %p1955_p0 }
 0x8a6   : > { %p1951_p13 = pneg %p1950_p12 }
 0x8a8   : > { %p1958_p3 = pnand %p1957_p2, %p1951_p13 }
 0x91c   : > { %v1119_v15 = vpop.xlane.xlu1 %1118 }
 0x91d   : > { %v1120_v16 = vsub.f32 %v1111_v9, %v1119_v15  ;;  %v1906_v9 = vld [vmem:[%s2458_s11 + $0x48] sm:$0xff]   ;;  %v1911_v15 = vld [vmem:[%s2458_s11 + $0x18] sm:$0xff]  }
 0x91f   : > { %v1121_v17 = vmul.f32 1.442695, %v1120_v16  ;;  %v1912_v16 = vld [vmem:[%s2458_s11 + $0x60] sm:$0xff]  }
 0x920   : > { %v1130_v18 = vpop.permute.xlu1 %1129 }
 0x921   : > { %1934 = vpow2.f32 %v1121_v17  ;;  %v1135_v19 = vsel %vm644_vm2, %v1130_v18, 0  ;;  %v1913_v17 = vld [vmem:[%s2458_s11 + $0x20] sm:$0xff]   ;;  %v1914_v18 = vld [vmem:[%s2458_s11 + $0x68] sm:$0xff]  }
 0x922   : > { %1816 = vmatpush3.bf16.msra.mxu0 %v1135_v19  ;;  %v1915_v19 = vld [vmem:[%s2458_s11 + $0x28] sm:$0xff]  }
 0x923   : > { %1332 = vmatprep.subr.bf16.mxu0 %v1894_v55 }
 0x92b   : > { %v1935_v20 = vpop.eup %1934 }
 0x92c   : > { %v1123_v26 = vsel %vm628_vm4, %v1935_v20, 0.0 }
 0x92d   : > { %1124 = vadd.xlane.f32.xlu0 %v1123_v26  ;;  %v1917_v26 = vld [vmem:[%s2458_s11 + $0x30] sm:$0xff]  }
 0x95b   : > { %v1060_v22 = vpop.f32.mrb[20].mxu0 }
 0x95c   : > { %v1066_v42 = vadd.f32 %v1060_v22, %v2261_v45  ;;  %v1807_v23 = vpop.f32.mrb[21].mxu0  ;;  %v1919_v22 = vld [vmem:[%s2458_s11 + $0x38] sm:$0xff]  }
 0x95d   : > { %v1063_v24 = vpop.f32.mrb[22].mxu0 }
 0x95e   : > { %v1808_v25 = vpop.f32.mrb[23].mxu0 }
 0x9ba   : > { %v1125_v27 = vpop.xlane.xlu0 %1124 }
 0x9bb   : > { %1936 = vrcp.f32 %v1125_v27 }
 0x9c5   : > { %v1937_v30 = vpop.eup %1936 }
 0x9c6   : > { %v1127_v32 = vmul.f32 %v1937_v30, %v1935_v20  ;;  %v1916_v20 = vld [vmem:[%s2458_s11 + $0x70] sm:$0xff]  }
 0x9c8   : > { %v1128_v33 = vpack.c.bf16 %v1127_v32, %v1127_v32 }
 0x9ca   : > { %1818 = vmatmul.mubr.msk.bf16.vlgmr.msra.gmra.mrb[24].mxu0 %vm628_vm4, %v1128_v33 }
 0x9cb   : > { %1364 = vmatprep.mubr.bf16.mxu0 %v2012_v11 }
 0xa9d   : > { %v1171_v34 = vpop.f32.mrb[24].mxu0 }
 0xa9e   : > { %v1177_v35 = vpack.c.bf16 %v1171_v34, %v1171_v34  ;;  %v1819_v36 = vpop.f32.mrb[25].mxu0 }
 0xa9f   : > { %v1174_v37 = vpop.f32.mrb[26].mxu0 }
 0xaa0   : > { %v1820_v38 = vpop.f32.mrb[27].mxu0  ;;  %1824 = vmatmul.mubr.msk.bf16.vlgmr.msra.gmra.mrb[20].mxu1 %vm581_vm3, %v1177_v35 }
 0xaa1   : > { %1734 = vmatpush3.bf16.msra.mxu1 %v1905_v8 }
 0xaa2   : > { %1735 = vmatprep.subr.bf16.mxu1 %v1906_v9 }
 0xaa5   : > { %1736 = vmatpush3.bf16.msra.mxu1 %v1907_v10 }
 0xaa6   : > { %1737 = vmatprep.subr.bf16.mxu1 %v1908_v12 }
 0xaa9   : > { %1738 = vmatpush3.bf16.msra.mxu1 %v1909_v13 }
 0xaaa   : > { %1739 = vmatprep.subr.bf16.mxu1 %v1910_v14 }
 0xaad   : > { %1740 = vmatpush3.bf16.msra.mxu1 %v1911_v15 }
 0xaae   : > { %1741 = vmatprep.subr.bf16.mxu1 %v1912_v16 }
 0xab1   : > { %1742 = vmatpush3.bf16.msra.mxu1 %v1913_v17 }
 0xab2   : > { %1743 = vmatprep.subr.bf16.mxu1 %v1914_v18 }
 0xab5   : > { %1744 = vmatpush3.bf16.msra.mxu1 %v1915_v19 }
 0xab6   : > { %1745 = vmatprep.subr.bf16.mxu1 %v1916_v20 }
 0xab9   : > { %1746 = vmatpush3.bf16.msra.mxu1 %v1917_v26 }
 0xaba   : > { %1747 = vmatprep.subr.bf16.mxu1 %v1918_v21 }
 0xabd   : > { %1748 = vmatpush3.bf16.msra.mxu1 %v1919_v22 }
 0xb73   : > { %v1223_v39 = vpop.f32.mrb[20].mxu1 }
 0xb74   : > { %v1229_v44 = vadd.f32 %v1223_v39, %v1066_v42  ;;  %v1825_v45 = vpop.f32.mrb[21].mxu1  ;;  %v1277_v42 = vld [vmem:[%s2457_s10] sm:$0x3] }
 0xb75   : > { %v1226_v46 = vpop.f32.mrb[22].mxu1  ;;  %v1282_v23 = vrot.slane %v1277_v42, %v482_v29  ;;  %v1286_v24 = vrot.slane %v1277_v42, %v486_v31 }
 0xb76   : > { %v1237_v47 = vadd.f32 %v1674_v41, %v1229_v44  ;;  %v1826_v48 = vpop.f32.mrb[23].mxu1 }
 0xb78   : > { %v2303_v49 = vadd.f32 %v1237_v47, %v2146_v0  ;;  %v1892_v0 = vld [vmem:[%s2456_s9] ss:$8 sps:$4 sm:$0xff]  }
 0xb79   : > { %1333 = vmatpush1.bf16.msra.mxu0 %v1892_v0 }
 0xb7a   : > { %v1241_v11 = vsel %vm440_vm0, %v2303_v49, 0.0  ;;  %1334 = vmatprep.subr.bf16.mxu0 %v1897_v56 }
 0xb7b   : > { %1242 = vadd.xlane.f32.xlu0 %v1241_v11 }
 0xb7d   : > { %1335 = vmatpush1.bf16.msra.mxu0 %v1895_v57 }
 0xb7e   : > { %1336 = vmatprep.subr.bf16.mxu0 %v1900_v58 }
 0xb81   : > { %1337 = vmatpush1.bf16.msra.mxu0 %v1898_v59 }
 0xb82   : > { %1338 = vmatprep.subr.bf16.mxu0 %v1903_v61 }
 0xb85   : > { %1339 = vmatpush1.bf16.msra.mxu0 %v1901_v60 }
 0xc08   : > { %v1243_v50 = vpop.xlane.xlu0 %1242 }
 0xc09   : > { %v1244_v51 = vmul.f32 0.015625, %v1243_v50  ;;  %v1688_v50 = vld [vmem:[%s2459_s12] ss:$0 sm:$0xff] }
 0xc0b   : > { %v1245_v52 = vsub.f32 %v2303_v49, %v1244_v51 }
 0xc0d   : > { %v1246_v53 = vmul.f32 %v1245_v52, %v1245_v52 }
 0xc0f   : > { %v1247_v54 = vsel %vm440_vm0, %v1246_v53, 0.0 }
 0xc10   : > { %1248 = vadd.xlane.f32.xlu0 %v1247_v54 }
 0xc9d   : > { %v1249_v43 = vpop.xlane.xlu0 %1248 }
 0xc9e   : > { %v1250_v62 = vmul.f32 0.015625, %v1249_v43 }
 0xca0   : > { %v1251_v63 = vadd.f32 1e-05, %v1250_v62 }
 0xca2   : > { %1938 = vrsqrt.f32 %v1251_v63 }
 0xcac   : > { %v1939_v1 = vpop.eup %1938 }
 0xcad   : > { %v1253_v3 = vmul.f32 %v1939_v1, %v1245_v52 }
 0xcaf   : > { %v1260_v4 = vmul.f32 %v1675_v2, %v1253_v3 }
 0xcb1   : > { %v1267_v5 = vadd.f32 %v1676_v40, %v1260_v4 }
 0xcb3   : > { %v1268_v6 = vpack.c.bf16 %v1267_v5, %v1267_v5 }
 0xcb5   : > { %1685 = vmatmul.mubr.msk.bf16.vlgmr.msra.gmra.mrb[28].mxu0 %vm440_vm0, %v1268_v6 }
 0xd88   : > { %v1366_v25 = vpop.f32.mrb[28].mxu0 }
 0xd89   : > { %v1367_v27 = vadd.f32 %v1366_v25, %v1282_v23  ;;  %v1368_v30 = vpop.f32.mrb[29].mxu0 }
 0xd8a   : > { %v1369_v32 = vadd.f32 %v1368_v30, %v1286_v24  ;;  %v1370_v33 = vpop.f32.mrb[30].mxu0 }
 0xd8b   : > { %v1686_v34 = vmul.f32 -1.702, %v1367_v27  ;;  %v1371_v35 = vpop.f32.mrb[31].mxu0 }
 0xd8c   : > { %v1687_v36 = vmul.f32 -1.702, %v1369_v32 }
 0xd8d   : > { %v1377_v37 = vmul.f32 1.442695, %v1686_v34 }
 0xd8e   : > { %v1379_v38 = vmul.f32 1.442695, %v1687_v36 }
 0xd8f   : > { %1940 = vpow2.f32 %v1377_v37 }
 0xd90   : > { %1942 = vpow2.f32 %v1379_v38 }
 0xd99   : > { %v1941_v39 = vpop.eup %1940 }
 0xd9a   : > { %v1943_v41 = vpop.eup %1942  ;;  %v1381_v44 = vadd.f32 1.0, %v1941_v39 }
 0xd9b   : > { %v1382_v29 = vadd.f32 1.0, %v1943_v41 }
 0xd9c   : > { %1944 = vrcp.f32 %v1381_v44 }
 0xd9d   : > { %1946 = vrcp.f32 %v1382_v29 }
 0xda6   : > { %v1945_v28 = vpop.eup %1944 }
 0xda7   : > { %v1947_v31 = vpop.eup %1946  ;;  %v1387_v45 = vmul.f32 %v1945_v28, %v1367_v27 }
 0xda8   : > { %v1388_v46 = vmul.f32 %v1947_v31, %v1369_v32 }
 0xda9   : > { %v1389_v48 = vpack.c.bf16 %v1387_v45, %v1387_v45 }
 0xdaa   : > { %v1390_v47 = vpack.c.bf16 %v1388_v46, %v1388_v46 }
 0xdac   : > { %1558 = vmatprep.mubr.bf16.mxu1 %v1390_v47 }
 0xdad   : > { %1559 = vmatmul.mubr.bf16.vlgmr.msra.gmra.mrb[24].mxu1 %v1389_v48 }
 0xe80   : > { %v1749_v11 = vpop.f32.mrb[24].mxu1 }
 0xe81   : > { %v1750_v51 = vpop.f32.mrb[25].mxu1 }
 0xe82   : > { %v1751_v52 = vadd.f32 %v1750_v51, %v1749_v11  ;;  %v1752_v53 = vpop.f32.mrb[26].mxu1 }
 0xe83   : > { %v1753_v54 = vpop.f32.mrb[27].mxu1 }
 0xe84   : > { %v1561_v55 = vadd.f32 %v1751_v52, %v1688_v50 }
 0xe86   : > { %v1566_v0 = vadd.f32 %v1561_v55, %v2303_v49 }
 0xe88   : > { %1567 = vst.msk [vmem:[%s431_s23] sm:$0xff] %vm440_vm0, %v1566_v0 }
 0xe89   : > { %1961 = shalt.err (!%p1958_p3)
}
 0xe8a   : > { %s1962_s20 = scalar_lea.hbm %s2404_s16, 128  ;;  %s1966_s30 = scalar_lea.hbm %s2460_s13, 256 }
 0xe8b   : > { %p1963_p4 = scmp.ne.s32.totalorder %s2404_s16, %s1962_s20  ;;  %p1967_p9 = scmp.lt.u32.totalorder %s2404_s16, %s2460_s13 }
 0xe8c   : > { %p1968_p10 = scmp.lt.u32.totalorder %s1966_s30, %s1962_s20  ;;  %p1970_p12 = scmp.lt.u32.totalorder %s1962_s20, %s2404_s16 }
 0xe8d   : > { %p1964_p7 = pnand %p1963_p4, %p2131_p5 }
 0xe8e   : > { %p1969_p11 = por %p1968_p10, %p1967_p9 }
 0xe8f   : > { %p1965_p8 = pneg %p1964_p7 }
 0xe90   : > { %p1971_p13 = por %p1970_p12, %p1969_p11 }
 0xe92   : > { %p1972_p0 = pnand %p1971_p13, %p1965_p8 }
 0xe94   : > { %1975 = shalt.err (!%p1972_p0)
}
 0xe95   : > { %1827 = dma.vmem_to_hbm [thread:$0]  (%p2131_p5), %s2406_s24, 128, %s2404_s16, %s1569_s0  }
 0xe96 PF: > { %p1833_p1 = scmp.ge.s32.totalorder %s2010_s28, 2  ;;  %s1594_s2 = sand.u32 1, %s1998_s25  }
 0xe97   : > { %s1595_s1 = scalar_lea.sflag [#allocation3], %s1594_s2 }
 0xe98   : > { %p1830_p2 = pnand %p1833_p1, %p2135_p6 }
 0xe9a   : > { %1993 = dma.done.wait (!%p1830_p2), %s1595_s1, 128  }
 0xe9b   : > { %1995 = vsyncadd (!%p1830_p2), %s1595_s1, 4294967168  ;;  %p23_p3 = scmp.ge.s32.totalorder %s2118_s14, 4   ;;  %s2469_s25 = smov %s2002_s26 }
 0xe9c   : > { %s2470_s26 = smov %s2006_s27  ;;  %s2471_s27 = smov %s2129_s17 }
 0xe9d   : > { %s2472_s28 = smov %s2118_s14  ;;  %25 = sbr.rel (!%p23_p3) target bundleno = 7 (0x7), region = 107 }
 0xea4   :  { %1600 = vsyncpa [#allocation3], 1 }
 0xea5   :  { %1602 = vsyncpa [#allocation3 + $0x1], 1 }

// kernel: transformer_forward.2
= control target key start
LH: loop header
LB: loop body
LE: loop exit
PB: predicated region body
PF: predicated region fallthrough
CT: control target
= control target key end

     0   :  { %s1984_s25 = smov 0   ;;  %s2262_s0 = inlined_call_operand.vmem [shape: f32[2,8,64], index: 0, kind: input, shape index: {}]   ;;  %s2263_s1 = inlined_call_operand.vmem [shape: f32[1,64], index: 1, kind: input, shape index: {}]   ;;  %s2264_s2 = inlined_call_operand.vmem [shape: f32[1,64], index: 2, kind: input, shape index: {}]   ;;  %s2265_s3 = inlined_call_operand.vmem [shape: bf16[64,192], index: 3, kind: input, shape index: {}]   ;;  %s2266_s4 = inlined_call_operand.vmem [shape: f32[1,192], index: 4, kind: input, shape index: {}]   ;;  %s2267_s5 = inlined_call_operand.vmem [shape: bf16[64,64], index: 5, kind: input, shape index: {}]   ;;  %s2268_s6 = inlined_call_operand.vmem [shape: f32[1,64], index: 6, kind: input, shape index: {}]   ;;  %s2269_s7 = inlined_call_operand.vmem [shape: f32[1,64], index: 7, kind: input, shape index: {}]   ;;  %s2270_s8 = inlined_call_operand.vmem [shape: f32[1,64], index: 8, kind: input, shape index: {}]   ;;  %s2271_s9 = inlined_call_operand.vmem [shape: bf16[64,256], index: 9, kind: input, shape index: {}]   ;;  %s2272_s10 = inlined_call_operand.vmem [shape: f32[1,256], index: 10, kind: input, shape index: {}]   ;;  %s2273_s11 = inlined_call_operand.vmem [shape: bf16[256,64], index: 11, kind: input, shape index: {}]   ;;  %s2274_s12 = inlined_call_operand.vmem [shape: f32[1,64], index: 12, kind: input, shape index: {}]   ;;  %s2275_s13 = inlined_call_operand.vmem [shape: f32[2,8,64], index: 13, kind: output, shape index: {}]  }
   0x1 LB: > { %s1621_s26 = sadd.s32 4294967295, %s1902_s25   ;;  %p1625_p0 = scmp.ge.s32.totalorder %s1902_s25, 1  ;;  %s1902_s25 = sphi %s1984_s25, %s23_s25  }
   0x2   : > { %p386_p1 = scmp.lt.s32.totalorder %s1902_s25, 3 }
   0x4   : > { %p387_p2 = pnand %p1625_p0, %p386_p1 }
   0x5   : > { %p428_p3 = scmp.lt.s32.totalorder (!%p387_p2), %s1621_s26, 1  ;;  %vm440_vm0 = vcmask (!%p387_p2), 523264   ;;  %v1824_v7 = vld [vmem:[%s2265_s3 + $0x4] ss:$8 sps:$4 sm:$0xff] (!%p387_p2)   ;;  %v1826_v8 = vld [vmem:[%s2265_s3] ss:$8 sps:$4 sm:$0xff] (!%p387_p2)   ;;  %v480_v27 = vlaneseq (!%p387_p2) }
   0x6   : > { %390 = sbr.rel (%p387_p2) target bundleno = 3708 (0xe7c), region = 72  ;;  %v1827_v9 = vld [vmem:[%s2265_s3 + $0x14] ss:$8 sps:$4 sm:$0xff] (!%p387_p2)   ;;  %533 = vmatprep.subr.bf16.mxu0 (!%p387_p2), %v1824_v7  ;;  %v1829_v10 = vld [vmem:[%s2265_s3 + $0x10] ss:$8 sps:$4 sm:$0xff] (!%p387_p2)   ;;  %v1904_v11 = vmov (!%p387_p2), 0  }
   0x7   : > { %534 = vmatpush1.bf16.msra.mxu0 (!%p387_p2), %v1826_v8  ;;  %565 = vmatprep.mubr.bf16.mxu0 (!%p387_p2), %v1904_v11  ;;  %v1830_v12 = vld [vmem:[%s2265_s3 + $0x24] ss:$8 sps:$4 sm:$0xff] (!%p387_p2)   ;;  %v1832_v13 = vld [vmem:[%s2265_s3 + $0x20] ss:$8 sps:$4 sm:$0xff] (!%p387_p2)   ;;  %v1833_v14 = vld [vmem:[%s2265_s3 + $0x34] ss:$8 sps:$4 sm:$0xff] (!%p387_p2)  }
   0x8   : > { %535 = vmatprep.subr.bf16.mxu0 (!%p387_p2), %v1827_v9  ;;  %v1835_v15 = vld [vmem:[%s2265_s3 + $0x30] ss:$8 sps:$4 sm:$0xff] (!%p387_p2)   ;;  %v1628_v20 = vld [vmem:[%s2263_s1] ss:$0 sm:$0xff] (!%p387_p2)  ;;  %v1905_v26 = vmov (!%p387_p2), 0.0   ;;  %v2040_v28 = vshrl.u32 (!%p387_p2), %v480_v27, 7 }
   0x9   : > { %v1629_v22 = vld [vmem:[%s2264_s2] ss:$0 sm:$0xff] (!%p387_p2)  ;;  %1740 = vmatprep.subr.bf16.mxu1 (!%p387_p2), %v1905_v26  ;;  %vm1906_vm1 = vmmov (!%p387_p2), 0   ;;  %vm644_vm2 = vcmask (!%p387_p2), 1043456   ;;  %s1907_s22 = smov (!%p387_p2), 64   ;;  %s1908_s23 = smov (!%p387_p2), 112  }
   0xa   : > { %v482_v29 = vsub.s32 (!%p387_p2), 0, %v2040_v28  ;;  %v478_v30 = vld [vmem:[%s2266_s4] sm:$0x3] (!%p387_p2)  ;;  %v486_v31 = vsub.s32 (!%p387_p2), 1, %v2040_v28  ;;  %1742 = vmatprep.mubr.msk.bf16.mxu1 (!%p387_p2), %vm1906_vm1, %v1905_v26  ;;  %s1909_s24 = smov (!%p387_p2), 48   ;;  %vm581_vm3 = vcmask (!%p387_p2), 130048  }
   0xb   : > { %536 = vmatpush1.bf16.msra.mxu0 (!%p387_p2), %v1829_v10  ;;  %vm628_vm4 = vcmask (!%p387_p2), 64512   ;;  %s1910_s28 = smov (!%p387_p2), 32   ;;  %s1911_s29 = smov (!%p387_p2), 96  }
   0xc   : > { %537 = vmatprep.subr.bf16.mxu0 (!%p387_p2), %v1830_v12  ;;  %v483_v32 = vrot.slane (!%p387_p2), %v478_v30, %v482_v29  ;;  %v487_v33 = vrot.slane (!%p387_p2), %v478_v30, %v486_v31  ;;  %s1912_s17 = smov (!%p387_p2), 80   ;;  %s1913_s18 = smov (!%p387_p2), 16  }
   0xd   : > { %s2277_s26 = smov (!%p428_p3, %s1621_s26), 1 }
   0xe   : > { %s1626_s27 = sshll.u32 %s2277_s26, 3 }
   0xf   : > { %s431_s30 = scalar_lea.vmem %s2262_s0, %s1626_s27  ;;  %538 = vmatpush1.bf16.msra.mxu0 %v1832_v13 }
  0x10   : > { %v2000_v0 = vld [vmem:[%s431_s30] sm:$0xff]  ;;  %539 = vmatprep.subr.bf16.mxu0 %v1833_v14  ;;  %s435_s30 = scalar_lea.vmem %s2275_s13, %s1626_s27 }
  0x11   : > { %v441_v1 = vsel %vm440_vm0, %v2000_v0, 0.0 }
  0x12   : > { %442 = vadd.xlane.f32.xlu0 %v441_v1 }
  0x13   : > { %540 = vmatpush1.bf16.msra.mxu0 %v1835_v15 }
  0x14   : > { %1734 = vmatprep.subr.bf16.mxu0 %v1905_v26 }
  0x9f   : > { %v443_v2 = vpop.xlane.xlu0 %442 }
  0xa0   : > { %v445_v3 = vmul.f32 0.015625, %v443_v2 }
  0xa2   : > { %v446_v4 = vsub.f32 %v2000_v0, %v445_v3 }
  0xa4   : > { %v447_v5 = vmul.f32 %v446_v4, %v446_v4 }
  0xa6   : > { %v448_v6 = vsel %vm440_vm0, %v447_v5, 0.0 }
  0xa7   : > { %449 = vadd.xlane.f32.xlu0 %v448_v6 }
 0x134   : > { %v450_v16 = vpop.xlane.xlu0 %449 }
 0x135   : > { %v451_v17 = vmul.f32 0.015625, %v450_v16 }
 0x137   : > { %v452_v18 = vadd.f32 1e-05, %v451_v17 }
 0x139   : > { %1868 = vrsqrt.f32 %v452_v18  ;;  %v1836_v18 = vld [vmem:[%s2267_s5] sm:$0xff]  }
 0x143   : > { %v1869_v19 = vpop.eup %1868 }
 0x144   : > { %v454_v21 = vmul.f32 %v1869_v19, %v446_v4  ;;  %v1837_v19 = vld [vmem:[%s2267_s5 + $0x8] sm:$0xff]  }
 0x146   : > { %v461_v23 = vmul.f32 %v1628_v20, %v454_v21 }
 0x148   : > { %v468_v24 = vadd.f32 %v1629_v22, %v461_v23 }
 0x14a   : > { %v469_v25 = vpack.c.bf16 %v468_v24, %v468_v24 }
 0x14c   : > { %1638 = vmatmul.mubr.msk.bf16.vlgmr.msra.gmra.mrb[0].mxu0 %vm440_vm0, %v469_v25 }
 0x14d   : > { %1736 = vmatprep.mubr.msk.bf16.mxu0 %vm1906_vm1, %v1905_v26 }
 0x21f   : > { %v567_v34 = vpop.f32.mrb[0].mxu0 }
 0x220   : > { %v568_v35 = vadd.f32 %v567_v34, %v483_v32  ;;  %v569_v36 = vpop.f32.mrb[1].mxu0 }
 0x221   : > { %v570_v37 = vadd.f32 %v569_v36, %v487_v33  ;;  %v571_v38 = vpop.f32.mrb[2].mxu0 }
 0x222   : > { %v574_v39 = vmul.f32 0.25, %v568_v35  ;;  %v2055_v40 = vpack.c.bf16 %v568_v35, %v568_v35  ;;  %v572_v41 = vpop.f32.mrb[3].mxu0 }
 0x223   : > { %v2057_v42 = vpack.c.bf16 %v570_v37, %v570_v37 }
 0x224   : > { %v2059_v43 = vpack.c.bf16 %v574_v39, %v574_v39  ;;  %579 = vrot.lane.b32.xlu1 %v2055_v40, %s1907_s22 }
 0x225   : > { %v646_v44 = vsel %vm644_vm2, %v2057_v42, 0 }
 0x226   : > { %1741 = vmatpush3.bf16.msra.mxu1 %v646_v44  ;;  %692 = vrot.lane.b32.xlu0 %v2059_v43, %s1908_s23 }
 0x227   : > { %1752 = vmatprep.subr.bf16.mxu1 %v1905_v26 }
 0x228   : > { %694 = vrot.lane.b32.xlu1 %v2055_v40, %s1909_s24 }
 0x296   : > { %v580_v45 = vpop.permute.xlu1 %579 }
 0x297   : > { %v586_v46 = vsel %vm581_vm3, %v580_v45, 0 }
 0x298   : > { %1735 = vmatpush3.bf16.xpose.msra.mxu0 %v586_v46  ;;  %v693_v49 = vpop.permute.xlu0 %692 }
 0x299   : > { %1746 = vmatprep.subr.bf16.mxu0 %v1905_v26 }
 0x29a   : > { %v695_v47 = vpop.permute.xlu1 %694 }
 0x29b   : > { %v700_v48 = vsel %vm581_vm3, %v695_v47, 0 }
 0x29f   : > { %1737 = vmatmul.mubr.msk.bf16.vlgmr.msra.gmra.mrb[4].mxu0 %vm581_vm3, %v2059_v43 }
 0x2a0   : > { %1747 = vmatpush3.bf16.xpose.msra.mxu0 %v700_v48  ;;  %1748 = vmatprep.mubr.msk.bf16.mxu0 %vm1906_vm1, %v1905_v26 }
 0x2a1   : > { %1758 = vmatprep.subr.bf16.mxu0 %v1905_v26 }
 0x2a7   : > { %1749 = vmatmul.mubr.msk.bf16.vlgmr.msra.gmra.mrb[8].mxu0 %vm581_vm3, %v693_v49 }
 0x2a8   : > { %1760 = vmatprep.mubr.msk.bf16.mxu0 %vm1906_vm1, %v1905_v26  ;;  %1759 = vmatpush3.bf16.msra.mxu0 %v1837_v19 }
 0x2a9   : > { %1770 = vmatprep.subr.bf16.mxu0 %v1905_v26 }
 0x372   : > { %v622_v50 = vpop.f32.mrb[4].mxu0 }
 0x373   : > { %v1738_v51 = vpop.f32.mrb[5].mxu0  ;;  %v629_v52 = vsel %vm628_vm4, %v622_v50, -inf }
 0x374   : > { %630 = vmax.xlane.f32.xlu1 %v629_v52  ;;  %v625_v53 = vpop.f32.mrb[6].mxu0 }
 0x375   : > { %v1739_v54 = vpop.f32.mrb[7].mxu0 }
 0x37a   : > { %v736_v55 = vpop.f32.mrb[8].mxu0 }
 0x37b   : > { %v1750_v56 = vpop.f32.mrb[9].mxu0  ;;  %v742_v57 = vsel %vm628_vm4, %v736_v55, -inf }
 0x37c   : > { %743 = vmax.xlane.f32.xlu0 %v742_v57  ;;  %v739_v58 = vpop.f32.mrb[10].mxu0 }
 0x37d   : > { %v1751_v59 = vpop.f32.mrb[11].mxu0 }
 0x392   : > { %906 = vrot.lane.b32.xlu0 %v2055_v40, %s1910_s28 }
 0x401   : > { %v631_v60 = vpop.xlane.xlu1 %630 }
 0x402   : > { %v632_v61 = vsub.f32 %v622_v50, %v631_v60 }
 0x404   : > { %v633_v62 = vmul.f32 1.442695, %v632_v61 }
 0x406   : > { %1870 = vpow2.f32 %v633_v62 }
 0x409   : > { %v744_v63 = vpop.xlane.xlu0 %743 }
 0x40a   : > { %v745_v1 = vsub.f32 %v736_v55, %v744_v63 }
 0x40c   : > { %v746_v2 = vmul.f32 1.442695, %v745_v1 }
 0x40d   : > { %v907_v25 = vpop.permute.xlu0 %906 }
 0x40e   : > { %1872 = vpow2.f32 %v746_v2  ;;  %v912_v34 = vsel %vm581_vm3, %v907_v25, 0 }
 0x410   : > { %v1871_v3 = vpop.eup %1870 }
 0x411   : > { %v635_v4 = vsel %vm628_vm4, %v1871_v3, 0.0 }
 0x412   : > { %636 = vadd.xlane.f32.xlu1 %v635_v4 }
 0x418   : > { %v1873_v5 = vpop.eup %1872 }
 0x419   : > { %v748_v6 = vsel %vm628_vm4, %v1873_v5, 0.0 }
 0x41a   : > { %749 = vadd.xlane.f32.xlu1 %v748_v6 }
 0x42b   : > { %755 = vrot.lane.b32.xlu1 %v2057_v42, %s1908_s23 }
 0x42f   : > { %904 = vrot.lane.b32.xlu1 %v2059_v43, %s1911_s29 }
 0x49f   : > { %v637_v7 = vpop.xlane.xlu1 %636 }
 0x4a0   : > { %1874 = vrcp.f32 %v637_v7 }
 0x4a7   : > { %v750_v8 = vpop.xlane.xlu1 %749 }
 0x4a8   : > { %1876 = vrcp.f32 %v750_v8 }
 0x4aa   : > { %v1875_v9 = vpop.eup %1874 }
 0x4ab   : > { %v639_v10 = vmul.f32 %v1875_v9, %v1871_v3  ;;  %v756_v12 = vpop.permute.xlu1 %755 }
 0x4ac   : > { %v761_v14 = vsel %vm644_vm2, %v756_v12, 0 }
 0x4ad   : > { %v640_v13 = vpack.c.bf16 %v639_v10, %v639_v10 }
 0x4af   : > { %1743 = vmatmul.mubr.msk.bf16.vlgmr.msra.gmra.mrb[0].mxu1 %vm628_vm4, %v640_v13  ;;  %v905_v36 = vpop.permute.xlu1 %904 }
 0x4b0   : > { %1753 = vmatpush3.bf16.msra.mxu1 %v761_v14  ;;  %1754 = vmatprep.mubr.msk.bf16.mxu1 %vm1906_vm1, %v1905_v26 }
 0x4b1   : > { %1764 = vmatprep.subr.bf16.mxu1 %v1905_v26 }
 0x4b2   : > { %v1877_v15 = vpop.eup %1876 }
 0x4b3   : > { %v752_v16 = vmul.f32 %v1877_v15, %v1873_v5 }
 0x4b5   : > { %v753_v17 = vpack.c.bf16 %v752_v16, %v752_v16 }
 0x4b7   : > { %1755 = vmatmul.mubr.msk.bf16.vlgmr.msra.gmra.mrb[4].mxu1 %vm628_vm4, %v753_v17 }
 0x4b8   : > { %1766 = vmatprep.mubr.msk.bf16.mxu1 %vm1906_vm1, %v1905_v26  ;;  %1765 = vmatpush3.bf16.msra.mxu1 %v1836_v18 }
 0x4b9   : > { %1776 = vmatprep.subr.bf16.mxu1 %v1905_v26 }
 0x582   : > { %v682_v20 = vpop.f32.mrb[0].mxu1 }
 0x583   : > { %v688_v21 = vpack.c.bf16 %v682_v20, %v682_v20  ;;  %v1744_v22 = vpop.f32.mrb[1].mxu1 }
 0x584   : > { %v685_v23 = vpop.f32.mrb[2].mxu1 }
 0x585   : > { %v1745_v24 = vpop.f32.mrb[3].mxu1  ;;  %1767 = vmatmul.mubr.msk.bf16.vlgmr.msra.gmra.mrb[8].mxu1 %vm581_vm3, %v688_v21  ;;  %v1839_v21 = vld [vmem:[%s2267_s5 + $0x18] sm:$0xff]  }
 0x586   : > { %1778 = vmatprep.mubr.msk.bf16.mxu1 %vm1906_vm1, %v1905_v26 }
 0x58a   : > { %v797_v27 = vpop.f32.mrb[4].mxu1 }
 0x58b   : > { %v803_v30 = vpack.c.bf16 %v797_v27, %v797_v27  ;;  %v1756_v32 = vpop.f32.mrb[5].mxu1 }
 0x58c   : > { %v800_v33 = vpop.f32.mrb[6].mxu1 }
 0x58d   : > { %v1757_v35 = vpop.f32.mrb[7].mxu1  ;;  %1761 = vmatmul.mubr.msk.bf16.vlgmr.msra.gmra.mrb[12].mxu0 %vm581_vm3, %v803_v30 }
 0x58e   : > { %1771 = vmatpush3.bf16.xpose.msra.mxu0 %v912_v34  ;;  %1772 = vmatprep.mubr.msk.bf16.mxu0 %vm1906_vm1, %v1905_v26 }
 0x58f   : > { %1782 = vmatprep.subr.bf16.mxu0 %v1905_v26 }
 0x595   : > { %1773 = vmatmul.mubr.msk.bf16.vlgmr.msra.gmra.mrb[16].mxu0 %vm581_vm3, %v905_v36 }
 0x596   : > { %1784 = vmatprep.mubr.msk.bf16.mxu0 %vm1906_vm1, %v1905_v26 }
 0x658   : > { %v898_v37 = vpop.f32.mrb[8].mxu1 }
 0x659   : > { %v1768_v38 = vpop.f32.mrb[9].mxu1 }
 0x65a   : > { %v901_v39 = vpop.f32.mrb[10].mxu1 }
 0x65b   : > { %v1769_v41 = vpop.f32.mrb[11].mxu1 }
 0x65c   : > { %v1655_v41 = vld [vmem:[%s2268_s6] ss:$0 sm:$0xff] }
 0x660   : > { %v849_v44 = vpop.f32.mrb[12].mxu0 }
 0x661   : > { %v2115_v45 = vadd.f32 %v898_v37, %v849_v44  ;;  %v1762_v46 = vpop.f32.mrb[13].mxu0 }
 0x662   : > { %v852_v47 = vpop.f32.mrb[14].mxu0 }
 0x663   : > { %v1763_v48 = vpop.f32.mrb[15].mxu0 }
 0x668   : > { %v948_v49 = vpop.f32.mrb[16].mxu0 }
 0x669   : > { %v1774_v50 = vpop.f32.mrb[17].mxu0  ;;  %v954_v51 = vsel %vm628_vm4, %v948_v49, -inf }
 0x66a   : > { %955 = vmax.xlane.f32.xlu1 %v954_v51  ;;  %v951_v52 = vpop.f32.mrb[18].mxu0 }
 0x66b   : > { %v1775_v53 = vpop.f32.mrb[19].mxu0 }
 0x67b   : > { %966 = vrot.lane.b32.xlu1 %v2057_v42, %s1911_s29 }
 0x67f   : > { %1067 = vrot.lane.b32.xlu1 %v2059_v43, %s1912_s17 }
 0x6f7   : > { %v956_v54 = vpop.xlane.xlu1 %955 }
 0x6f8   : > { %v957_v55 = vsub.f32 %v948_v49, %v956_v54 }
 0x6fa   : > { %v958_v56 = vmul.f32 1.442695, %v957_v55  ;;  %v1842_v55 = vld [vmem:[%s2271_s9 + $0x4] ss:$8 sps:$4 sm:$0xff]  }
 0x6fb   : > { %v967_v57 = vpop.permute.xlu1 %966 }
 0x6fc   : > { %1878 = vpow2.f32 %v958_v56  ;;  %v972_v58 = vsel %vm644_vm2, %v967_v57, 0  ;;  %v1845_v56 = vld [vmem:[%s2271_s9 + $0x14] ss:$8 sps:$4 sm:$0xff]   ;;  %v1843_v57 = vld [vmem:[%s2271_s9 + $0x10] ss:$8 sps:$4 sm:$0xff]  }
 0x6fd   : > { %1777 = vmatpush3.bf16.msra.mxu1 %v972_v58  ;;  %v1848_v58 = vld [vmem:[%s2271_s9 + $0x24] ss:$8 sps:$4 sm:$0xff]  }
 0x6fe   : > { %1788 = vmatprep.subr.bf16.mxu1 %v1905_v26 }
 0x6ff   : > { %v1068_v3 = vpop.permute.xlu1 %1067 }
 0x706   : > { %v1879_v59 = vpop.eup %1878 }
 0x707   : > { %v960_v60 = vsel %vm628_vm4, %v1879_v59, 0.0 }
 0x708   : > { %961 = vadd.xlane.f32.xlu0 %v960_v60  ;;  %v1849_v60 = vld [vmem:[%s2271_s9 + $0x30] ss:$8 sps:$4 sm:$0xff]  }
 0x71e   : > { %1069 = vrot.lane.b32.xlu0 %v2055_v40, %s1913_s18  ;;  %v1838_v40 = vld [vmem:[%s2267_s5 + $0x10] sm:$0xff]  }
 0x71f   : > { %1783 = vmatpush3.bf16.msra.mxu0 %v1838_v40  ;;  %v1657_v40 = vld [vmem:[%s2270_s8] ss:$0 sm:$0xff] }
 0x720   : > { %1794 = vmatprep.subr.bf16.mxu0 %v1905_v26 }
 0x795   : > { %v962_v61 = vpop.xlane.xlu0 %961 }
 0x796   : > { %1880 = vrcp.f32 %v962_v61  ;;  %v1851_v61 = vld [vmem:[%s2271_s9 + $0x34] ss:$8 sps:$4 sm:$0xff]  }
 0x799   : > { %v1070_v63 = vpop.permute.xlu0 %1069 }
 0x79a   : > { %v1075_v2 = vsel %vm581_vm3, %v1070_v63, 0 }
 0x7a0   : > { %v1881_v43 = vpop.eup %1880 }
 0x7a1   : > { %v964_v62 = vmul.f32 %v1881_v43, %v1879_v59  ;;  %v1846_v59 = vld [vmem:[%s2271_s9 + $0x20] ss:$8 sps:$4 sm:$0xff]  }
 0x7a3   : > { %v965_v1 = vpack.c.bf16 %v964_v62, %v964_v62 }
 0x7a5   : > { %1779 = vmatmul.mubr.msk.bf16.vlgmr.msra.gmra.mrb[12].mxu1 %vm628_vm4, %v965_v1 }
 0x7a6   : > { %1789 = vmatpush3.bf16.xpose.msra.mxu1 %v1075_v2  ;;  %1790 = vmatprep.mubr.msk.bf16.mxu1 %vm1906_vm1, %v1905_v26  ;;  %v1656_v2 = vld [vmem:[%s2269_s7] ss:$0 sm:$0xff] }
 0x7a7   : > { %1800 = vmatprep.subr.bf16.mxu1 %v1905_v26 }
 0x7ad   : > { %1791 = vmatmul.mubr.msk.bf16.vlgmr.msra.gmra.mrb[16].mxu1 %vm581_vm3, %v1068_v3 }
 0x7ae   : > { %1802 = vmatprep.mubr.msk.bf16.mxu1 %vm1906_vm1, %v1905_v26  ;;  %1801 = vmatpush3.bf16.msra.mxu1 %v1839_v21  ;;  %v1866_v21 = vld [vmem:[%s2273_s11 + $0x78] sm:$0xff]  }
 0x878   : > { %v1008_v4 = vpop.f32.mrb[12].mxu1 }
 0x879   : > { %v1014_v5 = vpack.c.bf16 %v1008_v4, %v1008_v4  ;;  %v1780_v6 = vpop.f32.mrb[13].mxu1 }
 0x87a   : > { %v1011_v7 = vpop.f32.mrb[14].mxu1 }
 0x87b   : > { %v1781_v8 = vpop.f32.mrb[15].mxu1  ;;  %1785 = vmatmul.mubr.msk.bf16.vlgmr.msra.gmra.mrb[20].mxu0 %vm581_vm3, %v1014_v5  ;;  %v1852_v7 = vld [vmem:[%s2273_s11 + $0x40] sm:$0xff]  }
 0x87c   : > { %1796 = vmatprep.mubr.msk.bf16.mxu0 %vm1906_vm1, %v1905_v26  ;;  %v1853_v8 = vld [vmem:[%s2273_s11] sm:$0xff]   ;;  %1712 = vmatprep.subr.bf16.mxu1 %v1852_v7 }
 0x880   : > { %v1111_v9 = vpop.f32.mrb[16].mxu1 }
 0x881   : > { %v1792_v10 = vpop.f32.mrb[17].mxu1  ;;  %v1117_v12 = vsel %vm628_vm4, %v1111_v9, -inf }
 0x882   : > { %1118 = vmax.xlane.f32.xlu1 %v1117_v12  ;;  %v1114_v13 = vpop.f32.mrb[18].mxu1  ;;  %v1855_v10 = vld [vmem:[%s2273_s11 + $0x8] sm:$0xff]   ;;  %v1856_v12 = vld [vmem:[%s2273_s11 + $0x50] sm:$0xff]  }
 0x883   : > { %v1793_v14 = vpop.f32.mrb[19].mxu1  ;;  %v1857_v13 = vld [vmem:[%s2273_s11 + $0x10] sm:$0xff]  }
 0x884   : > { %v1858_v14 = vld [vmem:[%s2273_s11 + $0x58] sm:$0xff]  }
 0x893   : > { %1129 = vrot.lane.b32.xlu1 %v2057_v42, %s1912_s17 }
 0x90f   : > { %v1119_v15 = vpop.xlane.xlu1 %1118 }
 0x910   : > { %v1120_v16 = vsub.f32 %v1111_v9, %v1119_v15  ;;  %v1854_v9 = vld [vmem:[%s2273_s11 + $0x48] sm:$0xff]   ;;  %v1859_v15 = vld [vmem:[%s2273_s11 + $0x18] sm:$0xff]  }
 0x912   : > { %v1121_v17 = vmul.f32 1.442695, %v1120_v16  ;;  %v1860_v16 = vld [vmem:[%s2273_s11 + $0x60] sm:$0xff]  }
 0x913   : > { %v1130_v18 = vpop.permute.xlu1 %1129 }
 0x914   : > { %1882 = vpow2.f32 %v1121_v17  ;;  %v1135_v19 = vsel %vm644_vm2, %v1130_v18, 0  ;;  %v1861_v17 = vld [vmem:[%s2273_s11 + $0x20] sm:$0xff]   ;;  %v1862_v18 = vld [vmem:[%s2273_s11 + $0x68] sm:$0xff]  }
 0x915   : > { %1795 = vmatpush3.bf16.msra.mxu0 %v1135_v19  ;;  %v1863_v19 = vld [vmem:[%s2273_s11 + $0x28] sm:$0xff]  }
 0x916   : > { %1332 = vmatprep.subr.bf16.mxu0 %v1842_v55 }
 0x91e   : > { %v1883_v20 = vpop.eup %1882 }
 0x91f   : > { %v1123_v26 = vsel %vm628_vm4, %v1883_v20, 0.0 }
 0x920   : > { %1124 = vadd.xlane.f32.xlu0 %v1123_v26  ;;  %v1865_v26 = vld [vmem:[%s2273_s11 + $0x30] sm:$0xff]  }
 0x94e   : > { %v1060_v22 = vpop.f32.mrb[20].mxu0 }
 0x94f   : > { %v1066_v42 = vadd.f32 %v1060_v22, %v2115_v45  ;;  %v1786_v23 = vpop.f32.mrb[21].mxu0  ;;  %v1867_v22 = vld [vmem:[%s2273_s11 + $0x38] sm:$0xff]  }
 0x950   : > { %v1063_v24 = vpop.f32.mrb[22].mxu0 }
 0x951   : > { %v1787_v25 = vpop.f32.mrb[23].mxu0 }
 0x9ad   : > { %v1125_v27 = vpop.xlane.xlu0 %1124 }
 0x9ae   : > { %1884 = vrcp.f32 %v1125_v27 }
 0x9b8   : > { %v1885_v30 = vpop.eup %1884 }
 0x9b9   : > { %v1127_v32 = vmul.f32 %v1885_v30, %v1883_v20  ;;  %v1864_v20 = vld [vmem:[%s2273_s11 + $0x70] sm:$0xff]  }
 0x9bb   : > { %v1128_v33 = vpack.c.bf16 %v1127_v32, %v1127_v32 }
 0x9bd   : > { %1797 = vmatmul.mubr.msk.bf16.vlgmr.msra.gmra.mrb[24].mxu0 %vm628_vm4, %v1128_v33 }
 0x9be   : > { %1364 = vmatprep.mubr.bf16.mxu0 %v1904_v11 }
 0xa90   : > { %v1171_v34 = vpop.f32.mrb[24].mxu0 }
 0xa91   : > { %v1177_v35 = vpack.c.bf16 %v1171_v34, %v1171_v34  ;;  %v1798_v36 = vpop.f32.mrb[25].mxu0 }
 0xa92   : > { %v1174_v37 = vpop.f32.mrb[26].mxu0 }
 0xa93   : > { %v1799_v38 = vpop.f32.mrb[27].mxu0  ;;  %1803 = vmatmul.mubr.msk.bf16.vlgmr.msra.gmra.mrb[20].mxu1 %vm581_vm3, %v1177_v35 }
 0xa94   : > { %1713 = vmatpush3.bf16.msra.mxu1 %v1853_v8 }
 0xa95   : > { %1714 = vmatprep.subr.bf16.mxu1 %v1854_v9 }
 0xa98   : > { %1715 = vmatpush3.bf16.msra.mxu1 %v1855_v10 }
 0xa99   : > { %1716 = vmatprep.subr.bf16.mxu1 %v1856_v12 }
 0xa9c   : > { %1717 = vmatpush3.bf16.msra.mxu1 %v1857_v13 }
 0xa9d   : > { %1718 = vmatprep.subr.bf16.mxu1 %v1858_v14 }
 0xaa0   : > { %1719 = vmatpush3.bf16.msra.mxu1 %v1859_v15 }
 0xaa1   : > { %1720 = vmatprep.subr.bf16.mxu1 %v1860_v16 }
 0xaa4   : > { %1721 = vmatpush3.bf16.msra.mxu1 %v1861_v17 }
 0xaa5   : > { %1722 = vmatprep.subr.bf16.mxu1 %v1862_v18 }
 0xaa8   : > { %1723 = vmatpush3.bf16.msra.mxu1 %v1863_v19 }
 0xaa9   : > { %1724 = vmatprep.subr.bf16.mxu1 %v1864_v20 }
 0xaac   : > { %1725 = vmatpush3.bf16.msra.mxu1 %v1865_v26 }
 0xaad   : > { %1726 = vmatprep.subr.bf16.mxu1 %v1866_v21 }
 0xab0   : > { %1727 = vmatpush3.bf16.msra.mxu1 %v1867_v22 }
 0xb66   : > { %v1223_v39 = vpop.f32.mrb[20].mxu1 }
 0xb67   : > { %v1229_v44 = vadd.f32 %v1223_v39, %v1066_v42  ;;  %v1804_v45 = vpop.f32.mrb[21].mxu1  ;;  %v1277_v42 = vld [vmem:[%s2272_s10] sm:$0x3] }
 0xb68   : > { %v1226_v46 = vpop.f32.mrb[22].mxu1  ;;  %v1282_v23 = vrot.slane %v1277_v42, %v482_v29  ;;  %v1286_v24 = vrot.slane %v1277_v42, %v486_v31 }
 0xb69   : > { %v1237_v47 = vadd.f32 %v1655_v41, %v1229_v44  ;;  %v1805_v48 = vpop.f32.mrb[23].mxu1 }
 0xb6b   : > { %v2157_v49 = vadd.f32 %v1237_v47, %v2000_v0  ;;  %v1840_v0 = vld [vmem:[%s2271_s9] ss:$8 sps:$4 sm:$0xff]  }
 0xb6c   : > { %1333 = vmatpush1.bf16.msra.mxu0 %v1840_v0 }
 0xb6d   : > { %v1241_v11 = vsel %vm440_vm0, %v2157_v49, 0.0  ;;  %1334 = vmatprep.subr.bf16.mxu0 %v1845_v56 }
 0xb6e   : > { %1242 = vadd.xlane.f32.xlu0 %v1241_v11 }
 0xb70   : > { %1335 = vmatpush1.bf16.msra.mxu0 %v1843_v57 }
 0xb71   : > { %1336 = vmatprep.subr.bf16.mxu0 %v1848_v58 }
 0xb74   : > { %1337 = vmatpush1.bf16.msra.mxu0 %v1846_v59 }
 0xb75   : > { %1338 = vmatprep.subr.bf16.mxu0 %v1851_v61 }
 0xb78   : > { %1339 = vmatpush1.bf16.msra.mxu0 %v1849_v60 }
 0xbfb   : > { %v1243_v50 = vpop.xlane.xlu0 %1242 }
 0xbfc   : > { %v1244_v51 = vmul.f32 0.015625, %v1243_v50  ;;  %v1669_v50 = vld [vmem:[%s2274_s12] ss:$0 sm:$0xff] }
 0xbfe   : > { %v1245_v52 = vsub.f32 %v2157_v49, %v1244_v51 }
 0xc00   : > { %v1246_v53 = vmul.f32 %v1245_v52, %v1245_v52 }
 0xc02   : > { %v1247_v54 = vsel %vm440_vm0, %v1246_v53, 0.0 }
 0xc03   : > { %1248 = vadd.xlane.f32.xlu0 %v1247_v54 }
 0xc90   : > { %v1249_v43 = vpop.xlane.xlu0 %1248 }
 0xc91   : > { %v1250_v62 = vmul.f32 0.015625, %v1249_v43 }
 0xc93   : > { %v1251_v63 = vadd.f32 1e-05, %v1250_v62 }
 0xc95   : > { %1886 = vrsqrt.f32 %v1251_v63 }
 0xc9f   : > { %v1887_v1 = vpop.eup %1886 }
 0xca0   : > { %v1253_v3 = vmul.f32 %v1887_v1, %v1245_v52 }
 0xca2   : > { %v1260_v4 = vmul.f32 %v1656_v2, %v1253_v3 }
 0xca4   : > { %v1267_v5 = vadd.f32 %v1657_v40, %v1260_v4 }
 0xca6   : > { %v1268_v6 = vpack.c.bf16 %v1267_v5, %v1267_v5 }
 0xca8   : > { %1666 = vmatmul.mubr.msk.bf16.vlgmr.msra.gmra.mrb[28].mxu0 %vm440_vm0, %v1268_v6 }
 0xd7b   : > { %v1366_v25 = vpop.f32.mrb[28].mxu0 }
 0xd7c   : > { %v1367_v27 = vadd.f32 %v1366_v25, %v1282_v23  ;;  %v1368_v30 = vpop.f32.mrb[29].mxu0 }
 0xd7d   : > { %v1369_v32 = vadd.f32 %v1368_v30, %v1286_v24  ;;  %v1370_v33 = vpop.f32.mrb[30].mxu0 }
 0xd7e   : > { %v1667_v34 = vmul.f32 -1.702, %v1367_v27  ;;  %v1371_v35 = vpop.f32.mrb[31].mxu0 }
 0xd7f   : > { %v1668_v36 = vmul.f32 -1.702, %v1369_v32 }
 0xd80   : > { %v1377_v37 = vmul.f32 1.442695, %v1667_v34 }
 0xd81   : > { %v1379_v38 = vmul.f32 1.442695, %v1668_v36 }
 0xd82   : > { %1888 = vpow2.f32 %v1377_v37 }
 0xd83   : > { %1890 = vpow2.f32 %v1379_v38 }
 0xd8c   : > { %v1889_v39 = vpop.eup %1888 }
 0xd8d   : > { %v1891_v41 = vpop.eup %1890  ;;  %v1381_v44 = vadd.f32 1.0, %v1889_v39 }
 0xd8e   : > { %v1382_v45 = vadd.f32 1.0, %v1891_v41 }
 0xd8f   : > { %1892 = vrcp.f32 %v1381_v44 }
 0xd90   : > { %1894 = vrcp.f32 %v1382_v45 }
 0xd99   : > { %v1893_v28 = vpop.eup %1892 }
 0xd9a   : > { %v1895_v29 = vpop.eup %1894  ;;  %v1387_v31 = vmul.f32 %v1893_v28, %v1367_v27 }
 0xd9b   : > { %v1388_v46 = vmul.f32 %v1895_v29, %v1369_v32 }
 0xd9c   : > { %v1389_v48 = vpack.c.bf16 %v1387_v31, %v1387_v31 }
 0xd9d   : > { %v1390_v47 = vpack.c.bf16 %v1388_v46, %v1388_v46 }
 0xd9f   : > { %1558 = vmatprep.mubr.bf16.mxu1 %v1390_v47 }
 0xda0   : > { %1559 = vmatmul.mubr.bf16.vlgmr.msra.gmra.mrb[24].mxu1 %v1389_v48 }
 0xe73   : > { %v1728_v11 = vpop.f32.mrb[24].mxu1 }
 0xe74   : > { %v1729_v51 = vpop.f32.mrb[25].mxu1 }
 0xe75   : > { %v1730_v52 = vadd.f32 %v1729_v51, %v1728_v11  ;;  %v1731_v53 = vpop.f32.mrb[26].mxu1 }
 0xe76   : > { %v1732_v54 = vpop.f32.mrb[27].mxu1 }
 0xe77   : > { %v1561_v55 = vadd.f32 %v1730_v52, %v1669_v50 }
 0xe79   : > { %v1566_v0 = vadd.f32 %v1561_v55, %v2157_v49 }
 0xe7b   : > { %1567 = vst.msk [vmem:[%s435_s30] sm:$0xff] %vm440_vm0, %v1566_v0 }
 0xe7c PF: > { %s23_s25 = sadd.s32 1, %s1902_s25  }
 0xe7d   : > { %p20_p4 = scmp.ge.s32.totalorder %s23_s25, 4  }
 0xe7f   :  { %22 = sbr.rel (!%p20_p4) target bundleno = 1 (0x1), region = 102 }

</bundles_post_ra>
